<compile_context>
chip_gen: v5e
topology: v5e:2x2
jax: 0.10.0
libtpu: 0.0.40
codegen_flags: <defaults>
</compile_context>

<pallas_src>
import functools

import jax
import jax.numpy as jnp
from jax import lax
from jax.experimental import pallas as pl
from jax.experimental.pallas import tpu as pltpu


_NEG_LARGE = -1.0e30  # finite stand-in for -inf inside the kernel (avoids inf-inf NaN)


def _round_up(x, m):
    return (x + m - 1) // m * m


def _router_kernel(x_ref, w_ref, b_ref, noise_ref, probs_ref, idx_ref, *, top_k):
    # x: (tile, Kp)   w: (Kp, 2*Ep)   b: (1, 2*Ep)   noise: (tile, Ep)
    # probs: (tile, Ep)   idx: (tile, IDX_PAD)
    ep = probs_ref.shape[-1]

    x = x_ref[...]
    # Single fused matmul for both linear layers; split at a 128-aligned lane
    # boundary (ep is a multiple of 128) so the slices are layout-free.
    both = jnp.dot(x, w_ref[...], preferred_element_type=jnp.float32) + b_ref[...]
    logits = both[:, :ep]
    nlog = both[:, ep:]

    # softplus(z) = max(z, 0) + log(1 + exp(-|z|))   (numerically stable; EUP exp/log)
    softplus = jnp.maximum(nlog, 0.0) + jnp.log(1.0 + jnp.exp(-jnp.abs(nlog)))
    noisy = logits + noise_ref[...].astype(jnp.float32) * softplus

    rows, _ = noisy.shape
    lane = lax.broadcasted_iota(jnp.int32, (rows, ep), 1).astype(jnp.float32)

    # Iterative top-k (top_k is small & static -> unrolled): repeatedly take the
    # row max, record its (lowest tied) lane index, then mask it out.
    work = noisy
    selected = jnp.zeros((rows, ep), dtype=jnp.bool_)
    top1 = None
    idx_cols = []
    for j in range(top_k):
        vmax = jnp.max(work, axis=-1, keepdims=True)                    # (rows, 1)
        if j == 0:
            top1 = vmax                                                  # row max for softmax
        amax = jnp.min(jnp.where(work == vmax, lane, float(ep)),
                       axis=-1, keepdims=True)                           # (rows, 1) argmax
        onehot = lane == amax
        selected = jnp.logical_or(selected, onehot)
        idx_cols.append(amax)
        work = jnp.where(onehot, _NEG_LARGE, work)

    # Sparse softmax: softmax over the k selected noisy logits, exact 0 elsewhere
    # (identical to softmax after scattering -inf into non-selected positions).
    p = jnp.where(selected, jnp.exp(noisy - top1), 0.0)
    denom = jnp.sum(p, axis=-1, keepdims=True)
    probs_ref[...] = (p / denom).astype(probs_ref.dtype)

    # Pack the top-k indices into the lane-padded (rows, IDX_PAD) output without
    # a lane-axis concatenate; columns >= top_k are left as 0 and sliced off.
    idx_pad = idx_ref.shape[-1]
    kidx = lax.broadcasted_iota(jnp.int32, (rows, idx_pad), 1)
    out_idx = jnp.zeros((rows, idx_pad), jnp.int32)
    for j, col in enumerate(idx_cols):
        out_idx = jnp.where(kidx == j, col.astype(jnp.int32), out_idx)
    idx_ref[...] = out_idx


def noisy_topk_router(x, w_route, b_route, w_noise, b_noise, noise, *, top_k,
                      tile_rows=256):
    """Fused NoisyTopkRouter forward.

    x:        (..., n_embed)
    w_route:  (n_embed, num_experts)   (transposed vs. nn.Linear.weight)
    b_route:  (num_experts,)
    w_noise:  (n_embed, num_experts)
    b_noise:  (num_experts,)
    noise:    (..., num_experts) pre-sampled standard normal (== torch.randn_like)
    Returns (router_probs (..., num_experts), indices (..., top_k) int32).
    """
    lead = x.shape[:-1]
    n_embed = x.shape[-1]
    num_experts = w_route.shape[-1]
    x2d = x.reshape(-1, n_embed)
    noise2d = noise.reshape(-1, num_experts)
    n_rows = x2d.shape[0]

    # Lane-dense padding: features (contraction dim) and experts (lane dim) -> x128.
    kp = _round_up(max(n_embed, 128), 128)
    ep = _round_up(max(num_experts, 128), 128)
    idx_pad = _round_up(max(top_k, 128), 128)
    # MXU-friendly row tile: multiple of 128, clamped so tiny inputs don't over-pad.
    tile = min(_round_up(max(tile_rows, 128), 128),
               _round_up(max(n_rows, 128), 128))
    n_rows_p = _round_up(n_rows, tile)

    xp = jnp.zeros((n_rows_p, kp), x.dtype).at[:n_rows, :n_embed].set(x2d)
    noisep = jnp.zeros((n_rows_p, ep), noise.dtype).at[:n_rows, :num_experts].set(noise2d)
    wrp = jnp.zeros((kp, ep), jnp.float32).at[:n_embed, :num_experts].set(
        w_route.astype(jnp.float32))
    wnp = jnp.zeros((kp, ep), jnp.float32).at[:n_embed, :num_experts].set(
        w_noise.astype(jnp.float32))
    # Padded expert columns get a hugely negative routing bias so they can never win
    # the top-k and contribute exactly 0 to the softmax.
    brp = jnp.full((1, ep), _NEG_LARGE, jnp.float32).at[0, :num_experts].set(
        b_route.reshape(-1).astype(jnp.float32))
    bnp = jnp.zeros((1, ep), jnp.float32).at[0, :num_experts].set(
        b_noise.reshape(-1).astype(jnp.float32))
    # Fuse the two linear layers into one matmul: (Kp, 2*Ep) weight, (1, 2*Ep) bias.
    wcat = jnp.concatenate([wrp, wnp], axis=1)
    bcat = jnp.concatenate([brp, bnp], axis=1)

    grid = (n_rows_p // tile,)
    itemsize = jnp.dtype(x.dtype).itemsize
    cost = pl.CostEstimate(
        flops=2 * n_rows_p * kp * (2 * ep),        # one fused matmul
        transcendentals=3 * n_rows_p * ep,         # exp (softplus) + log + exp (softmax)
        bytes_accessed=(xp.size + noisep.size) * itemsize
        + (wcat.size + bcat.size) * 4
        + n_rows_p * ep * itemsize + n_rows_p * idx_pad * 4,
    )

    probs_p, idx_p = pl.pallas_call(
        functools.partial(_router_kernel, top_k=top_k),
        out_shape=(
            jax.ShapeDtypeStruct((n_rows_p, ep), x.dtype),
            jax.ShapeDtypeStruct((n_rows_p, idx_pad), jnp.int32),
        ),
        grid_spec=pltpu.PrefetchScalarGridSpec(
            num_scalar_prefetch=0,
            grid=grid,
            in_specs=[
                pl.BlockSpec((tile, kp), lambda i: (i, 0)),      # x row tile
                pl.BlockSpec((kp, 2 * ep), lambda i: (0, 0)),    # [W_route | W_noise]
                pl.BlockSpec((1, 2 * ep), lambda i: (0, 0)),     # [b_route | b_noise]
                pl.BlockSpec((tile, ep), lambda i: (i, 0)),      # pre-sampled noise tile
            ],
            out_specs=(
                pl.BlockSpec((tile, ep), lambda i: (i, 0)),       # router probs (lane-dense)
                pl.BlockSpec((tile, idx_pad), lambda i: (i, 0)),  # top-k indices (lane-dense)
            ),
        ),
        compiler_params=pltpu.CompilerParams(
            dimension_semantics=("parallel",),   # row tiles shard across v7x's 2 TCs
        ),
        cost_estimate=cost,
    )(xp, wcat, bcat, noisep)

    probs = probs_p[:n_rows, :num_experts].reshape(*lead, num_experts)
    indices = idx_p[:n_rows, :top_k].reshape(*lead, top_k)
    return probs, indices


if __name__ == "__main__":
    key = jax.random.PRNGKey(0)
    kx, kw1, kb1, kw2, kb2, kn = jax.random.split(key, 6)

    B, T, n_embed, num_experts, top_k = 2, 8, 32, 8, 2

    # Snap demo inputs to bf16-representable f32 values so the kernel's and the
    # reference's matmul pass-count/precision cannot cause a mismatch.
    def snap(a):
        return a.astype(jnp.bfloat16).astype(jnp.float32)

    bound = 1.0 / (n_embed ** 0.5)
    x = snap(jax.random.normal(kx, (B, T, n_embed), jnp.float32))
    w_route = snap(jax.random.uniform(kw1, (n_embed, num_experts), jnp.float32, -bound, bound))
    b_route = snap(jax.random.uniform(kb1, (num_experts,), jnp.float32, -bound, bound))
    w_noise = snap(jax.random.uniform(kw2, (n_embed, num_experts), jnp.float32, -bound, bound))
    b_noise = snap(jax.random.uniform(kb2, (num_experts,), jnp.float32, -bound, bound))
    noise = jax.random.normal(kn, (B, T, num_experts), jnp.float32)  # torch.randn_like

    probs, idx = noisy_topk_router(x, w_route, b_route, w_noise, b_noise, noise,
                                   top_k=top_k)
    probs, idx = jax.block_until_ready((probs, idx))

    # Plain-JAX reference with the same pre-sampled noise.
    logits_ref = x @ w_route + b_route
    nlog_ref = x @ w_noise + b_noise
    noisy_ref = logits_ref + noise * jax.nn.softplus(nlog_ref)
    top_vals, top_idx = jax.lax.top_k(noisy_ref, top_k)
    sel = jax.nn.one_hot(top_idx, num_experts, dtype=jnp.bool_).any(axis=-2)
    probs_ref = jax.nn.softmax(jnp.where(sel, noisy_ref, -jnp.inf), axis=-1)

    assert probs.shape == (B, T, num_experts), probs.shape
    assert idx.shape == (B, T, top_k), idx.shape
    assert jnp.array_equal(idx, top_idx), "top-k indices mismatch vs reference"
    assert jnp.allclose(probs, probs_ref, atol=1e-4, rtol=1e-4), "router probs mismatch"

    print("KERNEL_OK")
</pallas_src>

<mosaic_0001>
module attributes {stable_mosaic.version = 11 : i64} {
  func.func @_router_kernel(%arg0: i32, %arg1: memref<128x128xf32, #tpu.memory_space<vmem>>, %arg2: memref<128x256xf32, #tpu.memory_space<vmem>>, %arg3: memref<1x256xf32, #tpu.memory_space<vmem>>, %arg4: memref<128x128xf32, #tpu.memory_space<vmem>>, %arg5: memref<128x128xf32, #tpu.memory_space<vmem>>, %arg6: memref<128x128xi32, #tpu.memory_space<vmem>>) attributes {dimension_semantics = [#tpu.dimension_semantics<parallel>], iteration_bounds = array<i64: 1>, scalar_prefetch = 0 : i64, scratch_operands = 0 : i64, tpu.core_type = #tpu.core_type<tc>, window_params = [{transform_indices = @transform_0, window_bounds = array<i64: 128, 128>}, {pipeline_mode = #tpu.pipeline_mode<synchronous>, transform_indices = @transform_1, window_bounds = array<i64: 128, 256>}, {pipeline_mode = #tpu.pipeline_mode<synchronous>, transform_indices = @transform_2, window_bounds = array<i64: 1, 256>}, {transform_indices = @transform_3, window_bounds = array<i64: 128, 128>}, {transform_indices = @transform_4, window_bounds = array<i64: 128, 128>}, {transform_indices = @transform_5, window_bounds = array<i64: 128, 128>}]} {
    %c0 = arith.constant 0 : index
    %c0_0 = arith.constant 0 : index
    %0 = vector.load %arg1[%c0, %c0_0] : memref<128x128xf32, #tpu.memory_space<vmem>>, vector<128x128xf32>
    %c0_1 = arith.constant 0 : index
    %c0_2 = arith.constant 0 : index
    %1 = vector.load %arg2[%c0_1, %c0_2] : memref<128x256xf32, #tpu.memory_space<vmem>>, vector<128x256xf32>
    %cst = arith.constant dense<0.000000e+00> : vector<128x256xf32>
    %2 = tpu.matmul %0, %1, %cst {dimension_numbers = #tpu.dot_dimension_numbers<[1], [0], [0], [1], [0, 0, 1, 1], [], []>} : vector<128x128xf32>, vector<128x256xf32>, vector<128x256xf32> -> vector<128x256xf32>
    %c0_3 = arith.constant 0 : index
    %c0_4 = arith.constant 0 : index
    %3 = vector.load %arg3[%c0_3, %c0_4] : memref<1x256xf32, #tpu.memory_space<vmem>>, vector<1x256xf32>
    %4 = vector.broadcast %3 : vector<1x256xf32> to vector<128x256xf32>
    %5 = arith.addf %2, %4 : vector<128x256xf32>
    %6 = vector.extract_strided_slice %5 {offsets = [0, 0], sizes = [128, 128], strides = [1, 1]} : vector<128x256xf32> to vector<128x128xf32>
    %7 = vector.extract_strided_slice %5 {offsets = [0, 128], sizes = [128, 128], strides = [1, 1]} : vector<128x256xf32> to vector<128x128xf32>
    %cst_5 = arith.constant 0.000000e+00 : f32
    %8 = vector.broadcast %cst_5 : f32 to vector<128x128xf32>
    %9 = arith.maximumf %7, %8 : vector<128x128xf32>
    %10 = math.absf %7 : vector<128x128xf32>
    %cst_6 = arith.constant 0.000000e+00 : f32
    %11 = vector.broadcast %cst_6 : f32 to vector<128x128xf32>
    %12 = arith.subf %11, %10 : vector<128x128xf32>
    %13 = math.exp %12 : vector<128x128xf32>
    %cst_7 = arith.constant 1.000000e+00 : f32
    %14 = vector.broadcast %cst_7 : f32 to vector<128x128xf32>
    %15 = arith.addf %14, %13 : vector<128x128xf32>
    %16 = math.log %15 : vector<128x128xf32>
    %17 = arith.addf %9, %16 : vector<128x128xf32>
    %c0_8 = arith.constant 0 : index
    %c0_9 = arith.constant 0 : index
    %18 = vector.load %arg4[%c0_8, %c0_9] : memref<128x128xf32, #tpu.memory_space<vmem>>, vector<128x128xf32>
    %19 = arith.mulf %18, %17 : vector<128x128xf32>
    %20 = arith.addf %6, %19 : vector<128x128xf32>
    %21 = tpu.iota {dimensions = array<i32: 1>} : vector<128x128xi32>
    %22 = arith.sitofp %21 : vector<128x128xi32> to vector<128x128xf32>
    %false = arith.constant false
    %23 = vector.broadcast %false : i1 to vector<128x128xi1>
    %cst_10 = arith.constant dense<0xFF800000> : vector<128xf32>
    %24 = vector.multi_reduction <maximumf>, %20, %cst_10 [1] : vector<128x128xf32> to vector<128xf32>
    %25 = vector.shape_cast %24 : vector<128xf32> to vector<128x1xf32>
    %26 = vector.broadcast %25 : vector<128x1xf32> to vector<128x128xf32>
    %27 = arith.cmpf oeq, %20, %26 : vector<128x128xf32>
    %cst_11 = arith.constant 1.280000e+02 : f32
    %28 = vector.broadcast %cst_11 : f32 to vector<128x128xf32>
    %29 = arith.select %27, %22, %28 : vector<128x128xi1>, vector<128x128xf32>
    %cst_12 = arith.constant dense<0x7F800000> : vector<128xf32>
    %30 = vector.multi_reduction <minimumf>, %29, %cst_12 [1] : vector<128x128xf32> to vector<128xf32>
    %31 = vector.shape_cast %30 : vector<128xf32> to vector<128x1xf32>
    %32 = vector.broadcast %31 : vector<128x1xf32> to vector<128x128xf32>
    %33 = arith.cmpf oeq, %22, %32 : vector<128x128xf32>
    %34 = arith.ori %23, %33 : vector<128x128xi1>
    %cst_13 = arith.constant -1.000000e+30 : f32
    %35 = vector.broadcast %cst_13 : f32 to vector<128x128xf32>
    %36 = arith.select %33, %35, %20 : vector<128x128xi1>, vector<128x128xf32>
    %cst_14 = arith.constant dense<0xFF800000> : vector<128xf32>
    %37 = vector.multi_reduction <maximumf>, %36, %cst_14 [1] : vector<128x128xf32> to vector<128xf32>
    %38 = vector.shape_cast %37 : vector<128xf32> to vector<128x1xf32>
    %39 = vector.broadcast %38 : vector<128x1xf32> to vector<128x128xf32>
    %40 = arith.cmpf oeq, %36, %39 : vector<128x128xf32>
    %cst_15 = arith.constant 1.280000e+02 : f32
    %41 = vector.broadcast %cst_15 : f32 to vector<128x128xf32>
    %42 = arith.select %40, %22, %41 : vector<128x128xi1>, vector<128x128xf32>
    %cst_16 = arith.constant dense<0x7F800000> : vector<128xf32>
    %43 = vector.multi_reduction <minimumf>, %42, %cst_16 [1] : vector<128x128xf32> to vector<128xf32>
    %44 = vector.shape_cast %43 : vector<128xf32> to vector<128x1xf32>
    %45 = vector.broadcast %44 : vector<128x1xf32> to vector<128x128xf32>
    %46 = arith.cmpf oeq, %22, %45 : vector<128x128xf32>
    %47 = arith.ori %34, %46 : vector<128x128xi1>
    %48 = vector.broadcast %25 : vector<128x1xf32> to vector<128x128xf32>
    %49 = arith.subf %20, %48 : vector<128x128xf32>
    %50 = math.exp %49 : vector<128x128xf32>
    %cst_17 = arith.constant 0.000000e+00 : f32
    %51 = vector.broadcast %cst_17 : f32 to vector<128x128xf32>
    %52 = arith.select %47, %50, %51 : vector<128x128xi1>, vector<128x128xf32>
    %cst_18 = arith.constant dense<0.000000e+00> : vector<128xf32>
    %53 = vector.multi_reduction <add>, %52, %cst_18 [1] : vector<128x128xf32> to vector<128xf32>
    %54 = vector.shape_cast %53 : vector<128xf32> to vector<128x1xf32>
    %55 = vector.broadcast %54 : vector<128x1xf32> to vector<128x128xf32>
    %56 = arith.divf %52, %55 : vector<128x128xf32>
    %c0_19 = arith.constant 0 : index
    %c0_20 = arith.constant 0 : index
    %57 = vector.load %arg5[%c0_19, %c0_20] : memref<128x128xf32, #tpu.memory_space<vmem>>, vector<128x128xf32>
    tpu.vector_store %arg5[%c0_19, %c0_20], %56 {strides = array<i32>} : memref<128x128xf32, #tpu.memory_space<vmem>>, vector<128x128xf32>,
    %58 = tpu.iota {dimensions = array<i32: 1>} : vector<128x128xi32>
    %c0_i32 = arith.constant 0 : i32
    %59 = vector.broadcast %c0_i32 : i32 to vector<128x128xi32>
    %c0_i32_21 = arith.constant 0 : i32
    %60 = vector.broadcast %c0_i32_21 : i32 to vector<128x128xi32>
    %61 = arith.cmpi eq, %58, %60 : vector<128x128xi32>
    %62 = arith.fptosi %31 : vector<128x1xf32> to vector<128x1xi32>
    %63 = vector.shape_cast %62 : vector<128x1xi32> to vector<128x1xi32>
    %64 = vector.broadcast %63 : vector<128x1xi32> to vector<128x128xi32>
    %65 = arith.select %61, %64, %59 : vector<128x128xi1>, vector<128x128xi32>
    %c1_i32 = arith.constant 1 : i32
    %66 = vector.broadcast %c1_i32 : i32 to vector<128x128xi32>
    %67 = arith.cmpi eq, %58, %66 : vector<128x128xi32>
    %68 = arith.fptosi %44 : vector<128x1xf32> to vector<128x1xi32>
    %69 = vector.shape_cast %68 : vector<128x1xi32> to vector<128x1xi32>
    %70 = vector.broadcast %69 : vector<128x1xi32> to vector<128x128xi32>
    %71 = arith.select %67, %70, %65 : vector<128x128xi1>, vector<128x128xi32>
    %c0_22 = arith.constant 0 : index
    %c0_23 = arith.constant 0 : index
    %72 = vector.load %arg6[%c0_22, %c0_23] : memref<128x128xi32, #tpu.memory_space<vmem>>, vector<128x128xi32>
    tpu.vector_store %arg6[%c0_22, %c0_23], %71 {strides = array<i32>} : memref<128x128xi32, #tpu.memory_space<vmem>>, vector<128x128xi32>,
    return
  }
  func.func @transform_0(%arg0: i32) -> (i32, i32) {
    %c0_i32 = arith.constant 0 : i32
    %c0_i32_0 = arith.constant 0 : i32
    return %arg0, %c0_i32 : i32, i32
  }
  func.func @transform_1(%arg0: i32) -> (i32, i32) {
    %c0_i32 = arith.constant 0 : i32
    %c0_i32_0 = arith.constant 0 : i32
    %c0_i32_1 = arith.constant 0 : i32
    return %c0_i32, %c0_i32_0 : i32, i32
  }
  func.func @transform_2(%arg0: i32) -> (i32, i32) {
    %c0_i32 = arith.constant 0 : i32
    %c0_i32_0 = arith.constant 0 : i32
    %c0_i32_1 = arith.constant 0 : i32
    return %c0_i32, %c0_i32_0 : i32, i32
  }
  func.func @transform_3(%arg0: i32) -> (i32, i32) {
    %c0_i32 = arith.constant 0 : i32
    %c0_i32_0 = arith.constant 0 : i32
    return %arg0, %c0_i32 : i32, i32
  }
  func.func @transform_4(%arg0: i32) -> (i32, i32) {
    %c0_i32 = arith.constant 0 : i32
    %c0_i32_0 = arith.constant 0 : i32
    return %arg0, %c0_i32 : i32, i32
  }
  func.func @transform_5(%arg0: i32) -> (i32, i32) {
    %c0_i32 = arith.constant 0 : i32
    %c0_i32_0 = arith.constant 0 : i32
    return %arg0, %c0_i32 : i32, i32
  }
}

</mosaic_0001>

<bundles_post_ra>
// kernel: tpu_custom_call.1
= control target key start
LH: loop header
LB: loop body
LE: loop exit
PB: predicated region body
PF: predicated region fallthrough
CT: control target
= control target key end

     0   :  { %11 = vsyncpa [#allocation3], 0  ;;  %s2535_s0 = inlined_call_operand.hbm [shape: f32[128,128], index: 0, kind: input, shape index: {}]   ;;  %s2536_s1 = inlined_call_operand.hbm [shape: f32[128,256], index: 1, kind: input, shape index: {}]   ;;  %s2537_s2 = inlined_call_operand.hbm [shape: f32[1,256], index: 2, kind: input, shape index: {}]   ;;  %s2538_s3 = inlined_call_operand.hbm [shape: f32[128,128], index: 3, kind: input, shape index: {}]   ;;  %s2539_s4 = inlined_call_operand.hbm [shape: f32[128,128], index: 4, kind: output, shape index: {0}]   ;;  %s2540_s5 = inlined_call_operand.hbm [shape: s32[128,128], index: 5, kind: output, shape index: {1}]  }
   0x1   :  { %12 = vsyncpa [#allocation6], 0 }
   0x2   :  { %13 = vsyncpa [#allocation9], 0 }
   0x3   :  { %14 = vsyncpa [#allocation4], 0  ;;  %s33_s20 = sshll.u32 %s2536_s1, 4  ;;  %s34_s20 = int_to_ptr.hbm [resolvable:$true] %s33_s20 }
   0x4   :  { %15 = vsyncpa [#allocation12], 0  ;;  %s1674_s21 = smov [#allocation5]   ;;  %s20_s25 = sshll.u32 %s2535_s0, 4  ;;  %s21_s25 = int_to_ptr.hbm [resolvable:$true] %s20_s25 }
   0x5   :  { %s35_s22 = sshll.u32 %s1674_s21, 4  ;;  %s1675_s26 = smov 256   ;;  %s36_s22 = int_to_ptr.vmem [resolvable:$true] %s35_s22 }
   0x6   :  { %s1676_s27 = smov 16   ;;  %s1677_s28 = smov [#allocation2]  }
   0x7   :  { %41 = dma.hbm_to_vmem [thread:$0]  %s34_s20, 4096, %s36_s22, [#allocation6], %s1675_s26, %s1675_s26, %s1676_s27  }
   0x8   :  { %s22_s29 = sshll.u32 %s1677_s28, 4  ;;  %s1678_s30 = smov 128   ;;  %s23_s29 = int_to_ptr.vmem [resolvable:$true] %s22_s29 }
   0x9   :  { %s1679_s6 = smov 8   ;;  %s47_s8 = sshll.u32 %s2537_s2, 4  ;;  %s48_s8 = int_to_ptr.hbm [resolvable:$true] %s47_s8 }
   0xa   :  { %28 = dma.hbm_to_vmem [thread:$0]  %s21_s25, 2048, %s23_s29, [#allocation3], %s1678_s30, %s1678_s30, %s1679_s6  }
   0xb   :  { %s1680_s9 = smov [#allocation7]   ;;  %s57_s12 = sshll.u32 %s2538_s3, 4  ;;  %s58_s12 = int_to_ptr.hbm [resolvable:$true] %s57_s12 }
   0xc   :  { %s49_s0 = sshll.u32 %s1680_s9, 4  ;;  %s1681_s13 = smov [#allocation8]   ;;  %s50_s0 = int_to_ptr.vmem [resolvable:$true] %s49_s0 }
   0xd   :  { %52 = dma.hbm_to_vmem [thread:$0]  %s48_s8, 32, %s50_s0, [#allocation6]  }
   0xe   :  { %s59_s14 = sshll.u32 %s1681_s13, 4  ;;  %s60_s14 = int_to_ptr.vmem [resolvable:$true] %s59_s14 }
   0xf   :  { %65 = dma.hbm_to_vmem [thread:$0]  %s58_s12, 2048, %s60_s14, [#allocation9], %s1678_s30, %s1678_s30, %s1679_s6  }
  0x10   :  { %1664 = dma.done.wait [#allocation3], 2048  }
  0x11   :  { %1665 = vsyncadd [#allocation3], 4294965248 }
  0x12   :  { %1666 = dma.done.wait [#allocation6], 4128  }
  0x13   :  { %1667 = vsyncadd [#allocation6], 4294963168 }
  0x14   :  { %1668 = dma.done.wait [#allocation9], 2048  }
  0x15   :  { %1669 = vsyncadd [#allocation9], 4294965248  ;;  %v129_v0 = vld [vmem:[#allocation5 + $0xf8] sm:$0xff]  ;;  %v127_v1 = vld [vmem:[#allocation5 + $0xe8] sm:$0xff]  ;;  %s1682_s2 = smov [#allocation11]   ;;  %s1170_s17 = sshll.u32 %s2540_s5, 4  ;;  %s1171_s17 = int_to_ptr.hbm [resolvable:$true] %s1170_s17 }
  0x16   :  { %201 = vmatpush.msra.mxu1 %v129_v0  ;;  %1206 = vmatpush.msra.mxu3 %v129_v0  ;;  %v125_v2 = vld [vmem:[#allocation5 + $0xd8] sm:$0xff]  ;;  %v123_v3 = vld [vmem:[#allocation5 + $0xc8] sm:$0xff]  ;;  %v128_v4 = vld [vmem:[#allocation5 + $0xf0] sm:$0xff]  ;;  %s1168_s3 = sshll.u32 %s1682_s2, 4  ;;  %s1683_s5 = smov [#allocation10]   ;;  %s1169_s3 = int_to_ptr.vmem [resolvable:$true] %s1168_s3 }
  0x17   :  { %v126_v5 = vld [vmem:[#allocation5 + $0xe0] sm:$0xff]  ;;  %v121_v6 = vld [vmem:[#allocation5 + $0xb8] sm:$0xff]  ;;  %136 = vmatpush.msra.mxu0 %v128_v4  ;;  %1190 = vmatpush.msra.mxu2 %v128_v4  ;;  %v124_v7 = vld [vmem:[#allocation5 + $0xd0] sm:$0xff]  ;;  %s1155_s18 = sshll.u32 %s1683_s5, 4  ;;  %s1157_s21 = sshll.u32 %s2539_s4, 4  ;;  %s1156_s18 = int_to_ptr.vmem [resolvable:$true] %s1155_s18  ;;  %s1158_s21 = int_to_ptr.hbm [resolvable:$true] %s1157_s21 }
  0x18   :  { %202 = vmatpush.msra.mxu1 %v127_v1  ;;  %1207 = vmatpush.msra.mxu3 %v127_v1  ;;  %v119_v8 = vld [vmem:[#allocation5 + $0xa8] sm:$0xff]  ;;  %v122_v9 = vld [vmem:[#allocation5 + $0xc0] sm:$0xff]  ;;  %v117_v10 = vld [vmem:[#allocation5 + $0x98] sm:$0xff] }
  0x19   :  { %137 = vmatpush.msra.mxu0 %v126_v5  ;;  %1191 = vmatpush.msra.mxu2 %v126_v5  ;;  %v120_v11 = vld [vmem:[#allocation5 + $0xb0] sm:$0xff]  ;;  %v115_v12 = vld [vmem:[#allocation5 + $0x88] sm:$0xff]  ;;  %v118_v13 = vld [vmem:[#allocation5 + $0xa0] sm:$0xff] }
  0x1a   :  { %203 = vmatpush.msra.mxu1 %v125_v2  ;;  %1208 = vmatpush.msra.mxu3 %v125_v2  ;;  %v113_v14 = vld [vmem:[#allocation5 + $0x78] sm:$0xff]  ;;  %v116_v15 = vld [vmem:[#allocation5 + $0x90] sm:$0xff]  ;;  %v111_v16 = vld [vmem:[#allocation5 + $0x68] sm:$0xff] }
  0x1b   :  { %138 = vmatpush.msra.mxu0 %v124_v7  ;;  %1192 = vmatpush.msra.mxu2 %v124_v7  ;;  %v114_v17 = vld [vmem:[#allocation5 + $0x80] sm:$0xff]  ;;  %v109_v18 = vld [vmem:[#allocation5 + $0x58] sm:$0xff]  ;;  %v112_v19 = vld [vmem:[#allocation5 + $0x70] sm:$0xff] }
  0x1c   :  { %204 = vmatpush.msra.mxu1 %v123_v3  ;;  %1209 = vmatpush.msra.mxu3 %v123_v3  ;;  %v107_v20 = vld [vmem:[#allocation5 + $0x48] sm:$0xff]  ;;  %v110_v21 = vld [vmem:[#allocation5 + $0x60] sm:$0xff]  ;;  %v105_v22 = vld [vmem:[#allocation5 + $0x38] sm:$0xff] }
  0x1d   :  { %139 = vmatpush.msra.mxu0 %v122_v9  ;;  %1193 = vmatpush.msra.mxu2 %v122_v9  ;;  %v108_v23 = vld [vmem:[#allocation5 + $0x50] sm:$0xff]  ;;  %v103_v24 = vld [vmem:[#allocation5 + $0x28] sm:$0xff]  ;;  %v106_v25 = vld [vmem:[#allocation5 + $0x40] sm:$0xff] }
  0x1e   :  { %205 = vmatpush.msra.mxu1 %v121_v6  ;;  %1210 = vmatpush.msra.mxu3 %v121_v6  ;;  %v101_v26 = vld [vmem:[#allocation5 + $0x18] sm:$0xff]  ;;  %v104_v27 = vld [vmem:[#allocation5 + $0x30] sm:$0xff]  ;;  %v99_v28 = vld [vmem:[#allocation5 + $0x8] sm:$0xff] }
  0x1f   :  { %140 = vmatpush.msra.mxu0 %v120_v11  ;;  %1194 = vmatpush.msra.mxu2 %v120_v11  ;;  %v82_v29 = vld [vmem:[#allocation2] sm:$0xff]  ;;  %v100_v32 = vld [vmem:[#allocation5 + $0x10] sm:$0xff]  ;;  %v83_v34 = vld [vmem:[#allocation2 + $0x8] sm:$0xff] }
  0x20   :  { %206 = vmatpush.msra.mxu1 %v119_v8  ;;  %1211 = vmatpush.msra.mxu3 %v119_v8  ;;  %v90_v30 = vld [vmem:[#allocation2 + $0x40] sm:$0xff]  ;;  %v91_v35 = vld [vmem:[#allocation2 + $0x48] sm:$0xff]  ;;  %v84_v36 = vld [vmem:[#allocation2 + $0x10] sm:$0xff] }
  0x21   :  { %141 = vmatpush.msra.mxu0 %v118_v13  ;;  %1195 = vmatpush.msra.mxu2 %v118_v13  ;;  %v102_v31 = vld [vmem:[#allocation5 + $0x20] sm:$0xff]  ;;  %v92_v37 = vld [vmem:[#allocation2 + $0x50] sm:$0xff]  ;;  %v85_v38 = vld [vmem:[#allocation2 + $0x18] sm:$0xff] }
  0x22   :  { %207 = vmatpush.msra.mxu1 %v117_v10  ;;  %1212 = vmatpush.msra.mxu3 %v117_v10  ;;  %v98_v33 = vld [vmem:[#allocation5] sm:$0xff]  ;;  %v93_v39 = vld [vmem:[#allocation2 + $0x58] sm:$0xff]  ;;  %v87_v42 = vld [vmem:[#allocation2 + $0x28] sm:$0xff] }
  0x23   :  { %142 = vmatpush.msra.mxu0 %v116_v15  ;;  %1196 = vmatpush.msra.mxu2 %v116_v15  ;;  %v86_v40 = vld [vmem:[#allocation2 + $0x20] sm:$0xff]  ;;  %v95_v43 = vld [vmem:[#allocation2 + $0x68] sm:$0xff]  ;;  %v88_v44 = vld [vmem:[#allocation2 + $0x30] sm:$0xff] }
  0x24   :  { %208 = vmatpush.msra.mxu1 %v115_v12  ;;  %1213 = vmatpush.msra.mxu3 %v115_v12  ;;  %v94_v41 = vld [vmem:[#allocation2 + $0x60] sm:$0xff]  ;;  %v96_v45 = vld [vmem:[#allocation2 + $0x70] sm:$0xff]  ;;  %v89_v46 = vld [vmem:[#allocation2 + $0x38] sm:$0xff] }
  0x25   :  { %143 = vmatpush.msra.mxu0 %v114_v17  ;;  %1197 = vmatpush.msra.mxu2 %v114_v17  ;;  %v97_v47 = vld [vmem:[#allocation2 + $0x78] sm:$0xff]  ;;  %v130_v48 = vld [vmem:[#allocation7] sm:$0x3] }
  0x26   :  { %209 = vmatpush.msra.mxu1 %v113_v14  ;;  %1214 = vmatpush.msra.mxu3 %v113_v14  ;;  %v1732_v49 = vperm.slane %v130_v48, 1 }
  0x27   :  { %144 = vmatpush.msra.mxu0 %v112_v19  ;;  %1198 = vmatpush.msra.mxu2 %v112_v19 }
  0x28   :  { %210 = vmatpush.msra.mxu1 %v111_v16  ;;  %1215 = vmatpush.msra.mxu3 %v111_v16 }
  0x29   :  { %145 = vmatpush.msra.mxu0 %v110_v21  ;;  %1199 = vmatpush.msra.mxu2 %v110_v21  ;;  %v1754_v21 = vperm.slane %v130_v48, 0 }
  0x2a   :  { %211 = vmatpush.msra.mxu1 %v109_v18  ;;  %1216 = vmatpush.msra.mxu3 %v109_v18 }
  0x2b   :  { %146 = vmatpush.msra.mxu0 %v108_v23  ;;  %1200 = vmatpush.msra.mxu2 %v108_v23 }
  0x2c   :  { %212 = vmatpush.msra.mxu1 %v107_v20  ;;  %1217 = vmatpush.msra.mxu3 %v107_v20 }
  0x2d   :  { %147 = vmatpush.msra.mxu0 %v106_v25  ;;  %1201 = vmatpush.msra.mxu2 %v106_v25 }
  0x2e   :  { %213 = vmatpush.msra.mxu1 %v105_v22  ;;  %1218 = vmatpush.msra.mxu3 %v105_v22 }
  0x2f   :  { %148 = vmatpush.msra.mxu0 %v104_v27  ;;  %1202 = vmatpush.msra.mxu2 %v104_v27 }
  0x30   :  { %214 = vmatpush.msra.mxu1 %v103_v24  ;;  %1219 = vmatpush.msra.mxu3 %v103_v24 }
  0x31   :  { %149 = vmatpush.msra.mxu0 %v102_v31  ;;  %1203 = vmatpush.msra.mxu2 %v102_v31 }
  0x32   :  { %215 = vmatpush.msra.mxu1 %v101_v26  ;;  %1220 = vmatpush.msra.mxu3 %v101_v26 }
  0x33   :  { %150 = vmatpush.msra.mxu0 %v100_v32  ;;  %1204 = vmatpush.msra.mxu2 %v100_v32 }
  0x34   :  { %216 = vmatpush.msra.mxu1 %v99_v28  ;;  %1221 = vmatpush.msra.mxu3 %v99_v28 }
  0x35   :  { %217 = vmatmul.f32.vlgmr.msra.gmra.mxu1 %v82_v29  ;;  %241 = vmatmul.f32.vlgmr.msra.gmra.mxu3 %v90_v30 }
  0x36   :  { %151 = vmatpush.msra.mxu0 %v98_v33  ;;  %1205 = vmatpush.msra.mxu2 %v98_v33 }
  0x37   :  { %152 = vmatmul.f32.vlgmr.msra.gmra.mxu0 %v82_v29  ;;  %176 = vmatmul.f32.vlgmr.msra.gmra.mxu2 %v90_v30  ;;  %v410_v29 = vld [vmem:[#allocation8] sm:$0xff] }
  0x3d   :  { %220 = vmatmul.f32.gmra.mxu1 %v83_v34  ;;  %244 = vmatmul.f32.gmra.mxu3 %v91_v35 }
  0x3f   :  { %155 = vmatmul.f32.gmra.mxu0 %v83_v34  ;;  %179 = vmatmul.f32.gmra.mxu2 %v91_v35 }
  0x45   :  { %223 = vmatmul.f32.gmra.mxu1 %v84_v36  ;;  %247 = vmatmul.f32.gmra.mxu3 %v92_v37 }
  0x47   :  { %158 = vmatmul.f32.gmra.mxu0 %v84_v36  ;;  %182 = vmatmul.f32.gmra.mxu2 %v92_v37 }
  0x4d   :  { %226 = vmatmul.f32.gmra.mxu1 %v85_v38  ;;  %250 = vmatmul.f32.gmra.mxu3 %v93_v39 }
  0x4f   :  { %161 = vmatmul.f32.gmra.mxu0 %v85_v38  ;;  %185 = vmatmul.f32.gmra.mxu2 %v93_v39 }
  0x55   :  { %229 = vmatmul.f32.gmra.mxu1 %v86_v40  ;;  %253 = vmatmul.f32.gmra.mxu3 %v94_v41 }
  0x57   :  { %164 = vmatmul.f32.gmra.mxu0 %v86_v40  ;;  %188 = vmatmul.f32.gmra.mxu2 %v94_v41 }
  0x5d   :  { %232 = vmatmul.f32.gmra.mxu1 %v87_v42  ;;  %256 = vmatmul.f32.gmra.mxu3 %v95_v43 }
  0x5f   :  { %167 = vmatmul.f32.gmra.mxu0 %v87_v42  ;;  %191 = vmatmul.f32.gmra.mxu2 %v95_v43 }
  0x65   :  { %235 = vmatmul.f32.gmra.mxu1 %v88_v44  ;;  %259 = vmatmul.f32.gmra.mxu3 %v96_v45 }
  0x67   :  { %170 = vmatmul.f32.gmra.mxu0 %v88_v44  ;;  %194 = vmatmul.f32.gmra.mxu2 %v96_v45 }
  0x6d   :  { %238 = vmatmul.f32.gmra.mxu1 %v89_v46  ;;  %262 = vmatmul.f32.gmra.mxu3 %v97_v47 }
  0x6f   :  { %173 = vmatmul.f32.gmra.mxu0 %v89_v46  ;;  %197 = vmatmul.f32.gmra.mxu2 %v97_v47 }
  0xb2   :  { %v218_v50 = vpop.f32.mrf.mxu1 }
  0xb3   :  { %v219_v51 = vadd.f32 %v218_v50, %v1732_v49 }
  0xb4   :  { %v153_v62 = vpop.f32.mrf.mxu0 }
  0xb5   :  { %v282_v52 = vand.u32 2147483647, %v219_v51  ;;  %v266_v25 = vmax.f32 %v219_v51, 0.0  ;;  %v154_v32 = vadd.f32 %v153_v62, %v1754_v21 }
  0xb7   :  { %v298_v53 = vsub.f32 0.0, %v282_v52 }
  0xb8   :  { %v242_v54 = vpop.f32.mrf.mxu3 }
  0xb9   :  { %v314_v55 = vmul.f32 1.442695, %v298_v53  ;;  %v1736_v56 = vadd.f32 %v242_v54, %v1732_v49  ;;  %v418_v54 = vld [vmem:[#allocation8 + $0x40] sm:$0xff] }
  0xba   :  { %v221_v57 = vpop.f32.mrf.mxu1  ;;  %v177_v9 = vpop.f32.mrf.mxu2 }
  0xbb   :  { %1392 = vpow2.f32 %v314_v55  ;;  %v290_v58 = vand.u32 2147483647, %v1736_v56  ;;  %v1740_v59 = vadd.f32 %v221_v57, %v1732_v49  ;;  %v274_v39 = vmax.f32 %v1736_v56, 0.0 }
  0xbc   :  { %v156_v15 = vpop.f32.mrf.mxu0 }
  0xbd   :  { %v306_v60 = vsub.f32 0.0, %v290_v58  ;;  %v283_v61 = vand.u32 2147483647, %v1740_v59  ;;  %v267_v50 = vmax.f32 %v1740_v59, 0.0  ;;  %v178_v58 = vadd.f32 %v177_v9, %v1754_v21  ;;  %v411_v59 = vld [vmem:[#allocation8 + $0x8] sm:$0xff] }
  0xbf   :  { %v330_v63 = vmul.f32 1.442695, %v306_v60  ;;  %v299_v0 = vsub.f32 0.0, %v283_v61  ;;  %v157_v61 = vadd.f32 %v156_v15, %v1754_v21 }
  0xc0   :  { %v245_v1 = vpop.f32.mrf.mxu3 }
  0xc1   :  { %v1393_v2 = vpop.eup %1392  ;;  %1394 = vpow2.f32 %v330_v63  ;;  %v316_v3 = vmul.f32 1.442695, %v299_v0  ;;  %v1744_v4 = vadd.f32 %v245_v1, %v1732_v49 }
  0xc2   :  { %v346_v5 = vadd.f32 1.0, %v1393_v2  ;;  %v224_v6 = vpop.f32.mrf.mxu1  ;;  %v1761_v33 = vpop.f32.mrf.mxu2 }
  0xc3   :  { %1396 = vpow2.f32 %v316_v3  ;;  %v291_v7 = vand.u32 2147483647, %v1744_v4  ;;  %v1748_v8 = vadd.f32 %v224_v6, %v1732_v49 }
  0xc4   :  { %1398 = vlog2.f32 %v346_v5  ;;  %v159_v47 = vpop.f32.mrf.mxu0 }
  0xc5   :  { %v307_v10 = vsub.f32 0.0, %v291_v7  ;;  %v284_v11 = vand.u32 2147483647, %v1748_v8 }
  0xc7   :  { %v1395_v12 = vpop.eup %1394  ;;  %v332_v13 = vmul.f32 1.442695, %v307_v10  ;;  %v300_v14 = vsub.f32 0.0, %v284_v11  ;;  %v275_v10 = vmax.f32 %v1744_v4, 0.0  ;;  %v268_v4 = vmax.f32 %v1748_v8, 0.0 }
  0xc8   :  { %v354_v16 = vadd.f32 1.0, %v1395_v12  ;;  %v248_v17 = vpop.f32.mrf.mxu3  ;;  %v160_v8 = vadd.f32 %v159_v47, %v1754_v21 }
  0xc9   :  { %v1397_v18 = vpop.eup %1396  ;;  %1400 = vpow2.f32 %v332_v13  ;;  %v318_v19 = vmul.f32 1.442695, %v300_v14  ;;  %v1752_v20 = vadd.f32 %v248_v17, %v1732_v49 }
  0xca   :  { %v1399_v22 = vpop.eup %1398  ;;  %1402 = vlog2.f32 %v354_v16  ;;  %v347_v23 = vadd.f32 1.0, %v1397_v18  ;;  %v227_v24 = vpop.f32.mrf.mxu1 }
  0xcb   :  { %v363_v26 = vmul.f32 0.6931472, %v1399_v22  ;;  %1404 = vpow2.f32 %v318_v19  ;;  %v292_v27 = vand.u32 2147483647, %v1752_v20  ;;  %v1758_v28 = vadd.f32 %v227_v24, %v1732_v49  ;;  %v183_v7 = vpop.f32.mrf.mxu2  ;;  %v419_v22 = vld [vmem:[#allocation8 + $0x48] sm:$0xff] }
  0xcc   :  { %1406 = vlog2.f32 %v347_v23 }
  0xcd   :  { %v394_v30 = vadd.f32 %v363_v26, %v266_v25  ;;  %v308_v31 = vsub.f32 0.0, %v292_v27  ;;  %v285_v34 = vand.u32 2147483647, %v1758_v28  ;;  %v1791_v27 = vpop.f32.mrf.mxu0 }
  0xcf   :  { %v1401_v35 = vpop.eup %1400  ;;  %v334_v36 = vmul.f32 1.442695, %v308_v31  ;;  %v426_v37 = vmul.f32 %v410_v29, %v394_v30  ;;  %v301_v41 = vsub.f32 0.0, %v285_v34  ;;  %v181_v31 = vadd.f32 %v1761_v33, %v1754_v21 }
  0xd0   :  { %v1403_v38 = vpop.eup %1402  ;;  %v355_v40 = vadd.f32 1.0, %v1401_v35  ;;  %v251_v42 = vpop.f32.mrf.mxu3 }
  0xd1   :  { %v1405_v43 = vpop.eup %1404  ;;  %v379_v44 = vmul.f32 0.6931472, %v1403_v38  ;;  %1408 = vpow2.f32 %v334_v36  ;;  %v1765_v45 = vadd.f32 %v426_v37, %v154_v32  ;;  %v1768_v46 = vadd.f32 %v251_v42, %v1732_v49  ;;  %v412_v32 = vld [vmem:[#allocation8 + $0x10] sm:$0xff] }
  0xd2   :  { %v1407_v48 = vpop.eup %1406  ;;  %1410 = vlog2.f32 %v355_v40  ;;  %v348_v51 = vadd.f32 1.0, %v1405_v43  ;;  %v320_v52 = vmul.f32 1.442695, %v301_v41  ;;  %v230_v53 = vpop.f32.mrf.mxu1  ;;  %v276_v42 = vmax.f32 %v1752_v20, 0.0 }
  0xd3   :  { %v402_v55 = vadd.f32 %v379_v44, %v274_v39  ;;  %v365_v56 = vmul.f32 0.6931472, %v1407_v48  ;;  %v293_v57 = vand.u32 2147483647, %v1768_v46  ;;  %461 = vmax.xlane.f32.xlu0 %v1765_v45  ;;  %v1775_v60 = vadd.f32 %v230_v53, %v1732_v49 }
  0xd4   :  { %1412 = vlog2.f32 %v348_v51 }
  0xd5   :  { %v395_v62 = vadd.f32 %v365_v56, %v267_v50  ;;  %1414 = vpow2.f32 %v320_v52  ;;  %v309_v63 = vsub.f32 0.0, %v293_v57  ;;  %v434_v0 = vmul.f32 %v418_v54, %v402_v55  ;;  %v186_v52 = vpop.f32.mrf.mxu2  ;;  %v420_v56 = vld [vmem:[#allocation8 + $0x50] sm:$0xff] }
  0xd6   :  { %v286_v1 = vand.u32 2147483647, %v1775_v60 }
  0xd7   :  { %v1409_v2 = vpop.eup %1408  ;;  %v336_v3 = vmul.f32 1.442695, %v309_v63  ;;  %v1779_v5 = vadd.f32 %v434_v0, %v178_v58  ;;  %v427_v6 = vmul.f32 %v411_v59, %v395_v62  ;;  %v184_v62 = vadd.f32 %v183_v7, %v1754_v21 }
  0xd8   :  { %v1411_v9 = vpop.eup %1410  ;;  %v356_v11 = vadd.f32 1.0, %v1409_v2  ;;  %v302_v12 = vsub.f32 0.0, %v286_v1  ;;  %v254_v13 = vpop.f32.mrf.mxu3 }
  0xd9   :  { %v381_v14 = vmul.f32 0.6931472, %v1411_v9  ;;  %1416 = vpow2.f32 %v336_v3  ;;  %v1782_v15 = vadd.f32 %v427_v6, %v157_v61  ;;  %v1785_v16 = vadd.f32 %v254_v13, %v1732_v49  ;;  %477 = vmax.xlane.f32.xlu2 %v1779_v5  ;;  %v165_v2 = vpop.f32.mrf.mxu0 }
  0xda   :  { %v1413_v17 = vpop.eup %1412  ;;  %1418 = vlog2.f32 %v356_v11  ;;  %v322_v18 = vmul.f32 1.442695, %v302_v12  ;;  %v233_v19 = vpop.f32.mrf.mxu1  ;;  %v269_v3 = vmax.f32 %v1758_v28, 0.0  ;;  %v277_v13 = vmax.f32 %v1768_v46, 0.0 }
  0xdb   :  { %v1415_v23 = vpop.eup %1414  ;;  %v403_v24 = vadd.f32 %v381_v14, %v275_v10  ;;  %v367_v25 = vmul.f32 0.6931472, %v1413_v17  ;;  %v294_v26 = vand.u32 2147483647, %v1785_v16  ;;  %463 = vmax.xlane.f32.xlu0 %v1782_v15  ;;  %v1794_v30 = vadd.f32 %v233_v19, %v1732_v49 }
  0xdc   :  { %v349_v29 = vadd.f32 1.0, %v1415_v23  ;;  %1420 = vpow2.f32 %v322_v18  ;;  %v163_v46 = vadd.f32 %v1791_v27, %v1754_v21 }
  0xdd   :  { %v396_v34 = vadd.f32 %v367_v25, %v268_v4  ;;  %v310_v35 = vsub.f32 0.0, %v294_v26  ;;  %v435_v36 = vmul.f32 %v419_v22, %v403_v24  ;;  %v287_v37 = vand.u32 2147483647, %v1794_v30  ;;  %v413_v24 = vld [vmem:[#allocation8 + $0x18] sm:$0xff] }
  0xde   :  { %1422 = vlog2.f32 %v349_v29  ;;  %v421_v25 = vld [vmem:[#allocation8 + $0x58] sm:$0xff] }
  0xdf   :  { %v1417_v38 = vpop.eup %1416  ;;  %v338_v39 = vmul.f32 1.442695, %v310_v35  ;;  %v428_v40 = vmul.f32 %v412_v32, %v396_v34  ;;  %v303_v44 = vsub.f32 0.0, %v287_v37  ;;  %v1801_v48 = vadd.f32 %v435_v36, %v181_v31  ;;  %v189_v34 = vpop.f32.mrf.mxu2 }
  0xe0   :  { %v1419_v41 = vpop.eup %1418  ;;  %v357_v43 = vadd.f32 1.0, %v1417_v38  ;;  %v257_v33 = vpop.f32.mrf.mxu3  ;;  %v187_v32 = vadd.f32 %v186_v52, %v1754_v21  ;;  %v270_v37 = vmax.f32 %v1775_v60, 0.0 }
  0xe1   :  { %v383_v50 = vmul.f32 0.6931472, %v1419_v41  ;;  %1424 = vpow2.f32 %v338_v39  ;;  %v1803_v51 = vadd.f32 %v428_v40, %v160_v8  ;;  %v1806_v47 = vadd.f32 %v257_v33, %v1732_v49 }
  0xe2   :  { %v1421_v53 = vpop.eup %1420  ;;  %1426 = vlog2.f32 %v357_v43  ;;  %v324_v54 = vmul.f32 1.442695, %v303_v44  ;;  %v236_v55 = vpop.f32.mrf.mxu1 }
  0xe3   :  { %v404_v57 = vadd.f32 %v383_v50, %v276_v42  ;;  %v350_v20 = vadd.f32 1.0, %v1421_v53  ;;  %v295_v58 = vand.u32 2147483647, %v1806_v47  ;;  %465 = vmax.xlane.f32.xlu1 %v1803_v51  ;;  %479 = vmax.xlane.f32.xlu0 %v1801_v48  ;;  %v1812_v59 = vadd.f32 %v236_v55, %v1732_v49  ;;  %v168_v44 = vpop.f32.mrf.mxu0 }
  0xe4   :  { %v1423_v61 = vpop.eup %1422  ;;  %1428 = vpow2.f32 %v324_v54  ;;  %v414_v54 = vld [vmem:[#allocation8 + $0x20] sm:$0xff] }
  0xe5   :  { %v369_v63 = vmul.f32 0.6931472, %v1423_v61  ;;  %1430 = vlog2.f32 %v350_v20  ;;  %v311_v0 = vsub.f32 0.0, %v295_v58  ;;  %v436_v1 = vmul.f32 %v420_v56, %v404_v57 }
  0xe6   :  { %v288_v6 = vand.u32 2147483647, %v1812_v59  ;;  %v278_v56 = vmax.f32 %v1785_v16, 0.0 }
  0xe7   :  { %v1425_v9 = vpop.eup %1424  ;;  %v340_v10 = vmul.f32 1.442695, %v311_v0  ;;  %v397_v12 = vadd.f32 %v369_v63, %v269_v3  ;;  %v1818_v7 = vadd.f32 %v436_v1, %v184_v62  ;;  %v166_v62 = vadd.f32 %v165_v2, %v1754_v21  ;;  %v422_v0 = vld [vmem:[#allocation8 + $0x60] sm:$0xff] }
  0xe8   :  { %v1427_v11 = vpop.eup %1426  ;;  %v358_v14 = vadd.f32 1.0, %v1425_v9  ;;  %v304_v17 = vsub.f32 0.0, %v288_v6  ;;  %v260_v18 = vpop.f32.mrf.mxu3  ;;  %v190_v63 = vadd.f32 %v189_v34, %v1754_v21 }
  0xe9   :  { %v385_v19 = vmul.f32 0.6931472, %v1427_v11  ;;  %1432 = vpow2.f32 %v340_v10  ;;  %v1821_v22 = vadd.f32 %v260_v18, %v1732_v49  ;;  %v429_v38 = vmul.f32 %v413_v24, %v397_v12  ;;  %v192_v12 = vpop.f32.mrf.mxu2 }
  0xea   :  { %v1429_v23 = vpop.eup %1428  ;;  %1434 = vlog2.f32 %v358_v14  ;;  %v326_v28 = vmul.f32 1.442695, %v304_v17  ;;  %v239_v4 = vpop.f32.mrf.mxu1  ;;  %v271_v10 = vmax.f32 %v1794_v30, 0.0  ;;  %v279_v24 = vmax.f32 %v1806_v47, 0.0 }
  0xeb   :  { %v1431_v26 = vpop.eup %1430  ;;  %v405_v29 = vadd.f32 %v385_v19, %v277_v13  ;;  %v351_v31 = vadd.f32 1.0, %v1429_v23  ;;  %481 = vmax.xlane.f32.xlu1 %v1818_v7  ;;  %v296_v36 = vand.u32 2147483647, %v1821_v22  ;;  %v1829_v8 = vadd.f32 %v239_v4, %v1732_v49  ;;  %v415_v23 = vld [vmem:[#allocation8 + $0x28] sm:$0xff]  ;;  %v171_v30 = vpop.f32.mrf.mxu0 }
  0xec   :  { %v371_v35 = vmul.f32 0.6931472, %v1431_v26  ;;  %1436 = vpow2.f32 %v326_v28  ;;  %v1836_v57 = vadd.f32 %v429_v38, %v163_v46  ;;  %v272_v47 = vmax.f32 %v1812_v59, 0.0 }
  0xed   :  { %1438 = vlog2.f32 %v351_v31  ;;  %v437_v39 = vmul.f32 %v421_v25, %v405_v29  ;;  %v312_v40 = vsub.f32 0.0, %v296_v36  ;;  %v289_v27 = vand.u32 2147483647, %v1829_v8  ;;  %v423_v31 = vld [vmem:[#allocation8 + $0x68] sm:$0xff] }
  0xee   :  { %v398_v42 = vadd.f32 %v371_v35, %v270_v37  ;;  %v169_v29 = vadd.f32 %v168_v44, %v1754_v21  ;;  %v193_v36 = vadd.f32 %v192_v12, %v1754_v21 }
  0xef   :  { %v1433_v41 = vpop.eup %1432  ;;  %v1833_v43 = vadd.f32 %v437_v39, %v187_v32  ;;  %v342_v52 = vmul.f32 1.442695, %v312_v40  ;;  %v305_v53 = vsub.f32 0.0, %v289_v27  ;;  %v416_v39 = vld [vmem:[#allocation8 + $0x30] sm:$0xff]  ;;  %v172_v27 = vadd.f32 %v171_v30, %v1754_v21 }
  0xf0   :  { %v1435_v33 = vpop.eup %1434  ;;  %v359_v50 = vadd.f32 1.0, %v1433_v41  ;;  %v263_v55 = vpop.f32.mrf.mxu3  ;;  %v430_v16 = vmul.f32 %v414_v54, %v398_v42 }
  0xf1   :  { %v387_v60 = vmul.f32 0.6931472, %v1435_v33  ;;  %v1839_v20 = vadd.f32 %v263_v55, %v1732_v49  ;;  %483 = vmax.xlane.f32.xlu2 %v1833_v43  ;;  %v328_v61 = vmul.f32 1.442695, %v305_v53  ;;  %v195_v44 = vpop.f32.mrf.mxu2  ;;  %v280_v55 = vmax.f32 %v1821_v22, 0.0 }
  0xf2   :  { %v1437_v58 = vpop.eup %1436  ;;  %1440 = vlog2.f32 %v359_v50  ;;  %v1847_v14 = vadd.f32 %v430_v16, %v166_v62  ;;  %v424_v62 = vld [vmem:[#allocation8 + $0x70] sm:$0xff] }
  0xf3   :  { %v1439_v1 = vpop.eup %1438  ;;  %v406_v3 = vadd.f32 %v387_v60, %v278_v56  ;;  %v352_v6 = vadd.f32 1.0, %v1437_v58  ;;  %1442 = vpow2.f32 %v342_v52  ;;  %467 = vmax.xlane.f32.xlu1 %v1836_v57  ;;  %v297_v49 = vand.u32 2147483647, %v1839_v20  ;;  %v174_v60 = vpop.f32.mrf.mxu0 }
  0xf4   :  { %v373_v9 = vmul.f32 0.6931472, %v1439_v1  ;;  %1444 = vpow2.f32 %v328_v61  ;;  %v273_v58 = vmax.f32 %v1829_v8, 0.0  ;;  %v417_v1 = vld [vmem:[#allocation8 + $0x38] sm:$0xff] }
  0xf5   :  { %1446 = vlog2.f32 %v352_v6  ;;  %v438_v11 = vmul.f32 %v422_v0, %v406_v3  ;;  %v313_v2 = vsub.f32 0.0, %v297_v49  ;;  %v196_v0 = vadd.f32 %v195_v44, %v1754_v21 }
  0xf6   :  { %v399_v13 = vadd.f32 %v373_v9, %v271_v10  ;;  %v175_v6 = vadd.f32 %v174_v60, %v1754_v21 }
  0xf7   :  { %v1849_v17 = vadd.f32 %v438_v11, %v190_v63  ;;  %v344_v19 = vmul.f32 1.442695, %v313_v2  ;;  %v281_v11 = vmax.f32 %v1839_v20, 0.0  ;;  %v425_v2 = vld [vmem:[#allocation8 + $0x78] sm:$0xff] }
  0xf8   :  { %v1441_v18 = vpop.eup %1440  ;;  %v431_v35 = vmul.f32 %v415_v23, %v399_v13 }
  0xf9   :  { %v1443_v28 = vpop.eup %1442  ;;  %v389_v4 = vmul.f32 0.6931472, %v1441_v18  ;;  %469 = vmax.xlane.f32.xlu2 %v1847_v14  ;;  %485 = vmax.xlane.f32.xlu0 %v1849_v17  ;;  %1448 = vpow2.f32 %v344_v19  ;;  %v198_v10 = vpop.f32.mrf.mxu2 }
  0xfa   :  { %v1445_v25 = vpop.eup %1444  ;;  %v360_v26 = vadd.f32 1.0, %v1443_v28  ;;  %v1858_v41 = vadd.f32 %v431_v35, %v169_v29  ;;  %v199_v18 = vadd.f32 %v198_v10, %v1754_v21  ;;  %v458_v28 = vlaneseq }
  0xfb   :  { %v1447_v46 = vpop.eup %1446  ;;  %v407_v32 = vadd.f32 %v389_v4, %v279_v24  ;;  %v353_v34 = vadd.f32 1.0, %v1445_v25 }
  0xfc   :  { %v375_v37 = vmul.f32 0.6931472, %v1447_v46  ;;  %1450 = vlog2.f32 %v360_v26  ;;  %v1882_v24 = vand.u32 127, %v458_v28 }
  0xfd   :  { %1452 = vlog2.f32 %v353_v34  ;;  %v439_v38 = vmul.f32 %v423_v31, %v407_v32 }
  0xfe   :  { %v400_v40 = vadd.f32 %v375_v37, %v272_v47  ;;  %v1885_v20 = vcvt.s32.f32 %v1882_v24 }
  0xff   :  { %v1860_v42 = vadd.f32 %v439_v38, %v193_v36  ;;  %v1449_v33 = vpop.eup %1448 }
 0x100   :  { %v432_v50 = vmul.f32 %v416_v39, %v400_v40  ;;  %v361_v52 = vadd.f32 1.0, %v1449_v33 }
 0x101   :  { %471 = vmax.xlane.f32.xlu2 %v1858_v41  ;;  %487 = vmax.xlane.f32.xlu1 %v1860_v42 }
 0x102   :  { %v1451_v59 = vpop.eup %1450  ;;  %v1864_v53 = vadd.f32 %v432_v50, %v172_v27  ;;  %1454 = vlog2.f32 %v361_v52 }
 0x103   :  { %v1453_v54 = vpop.eup %1452  ;;  %v391_v56 = vmul.f32 0.6931472, %v1451_v59 }
 0x104   :  { %v377_v61 = vmul.f32 0.6931472, %v1453_v54  ;;  %473 = vmax.xlane.f32.xlu0 %v1864_v53 }
 0x105   :  { %v408_v63 = vadd.f32 %v391_v56, %v280_v55 }
 0x106   :  { %v401_v3 = vadd.f32 %v377_v61, %v273_v58 }
 0x107   :  { %v440_v16 = vmul.f32 %v424_v62, %v408_v63 }
 0x108   :  { %v433_v9 = vmul.f32 %v417_v1, %v401_v3  ;;  %v1455_v49 = vpop.eup %1454 }
 0x109   :  { %v1871_v22 = vadd.f32 %v440_v16, %v196_v0  ;;  %v393_v8 = vmul.f32 0.6931472, %v1455_v49 }
 0x10a   :  { %v1874_v12 = vadd.f32 %v433_v9, %v175_v6 }
 0x10b   :  { %2563 = vst [vmem:[#allocation18_spill] sm:$0xff] %v1871_v22  ;;  %489 = vmax.xlane.f32.xlu2 %v1871_v22  ;;  %v409_v13 = vadd.f32 %v393_v8, %v281_v11 }
 0x10c   :  { %2564 = vst [vmem:[#allocation19_spill] sm:$0xff] %v1874_v12  ;;  %475 = vmax.xlane.f32.xlu1 %v1874_v12 }
 0x10d   :  { %v441_v19 = vmul.f32 %v425_v2, %v409_v13 }
 0x10f   :  { %v1879_v23 = vadd.f32 %v441_v19, %v199_v18 }
 0x111   :  { %2565 = vst [vmem:[#allocation20_spill] sm:$0xff] %v1879_v23  ;;  %491 = vmax.xlane.f32.xlu0 %v1879_v23 }
 0x146   :  { %v1887_v4 = vpop.xlane.xlu0 %461 }
 0x147   :  { %vm493_vm0 = vcmp.eq.f32.partialorder %v1765_v45, %v1887_v4 }
 0x148   :  { %v509_v30 = vsel %vm493_vm0, %v1885_v20, 128.0 }
 0x149   :  { %525 = vmin.xlane.f32.xlu1 %v509_v30 }
 0x14c   :  { %v1892_v21 = vpop.xlane.xlu2 %477 }
 0x14d   :  { %vm501_vm1 = vcmp.eq.f32.partialorder %v1779_v5, %v1892_v21 }
 0x14e   :  { %v1896_v25 = vpop.xlane.xlu0 %463  ;;  %v517_v26 = vsel %vm501_vm1, %v1885_v20, 128.0 }
 0x14f   :  { %541 = vmin.xlane.f32.xlu0 %v517_v26  ;;  %vm494_vm2 = vcmp.eq.f32.partialorder %v1782_v15, %v1896_v25 }
 0x150   :  { %v510_v29 = vsel %vm494_vm2, %v1885_v20, 128.0 }
 0x151   :  { %527 = vmin.xlane.f32.xlu2 %v510_v29 }
 0x156   :  { %v1902_v31 = vpop.xlane.xlu1 %465  ;;  %v1904_v46 = vpop.xlane.xlu0 %479 }
 0x157   :  { %vm495_vm3 = vcmp.eq.f32.partialorder %v1803_v51, %v1902_v31  ;;  %vm502_vm4 = vcmp.eq.f32.partialorder %v1801_v48, %v1904_v46 }
 0x158   :  { %v511_v32 = vsel %vm495_vm3, %v1885_v20, 128.0  ;;  %v518_v34 = vsel %vm502_vm4, %v1885_v20, 128.0 }
 0x159   :  { %529 = vmin.xlane.f32.xlu0 %v511_v32  ;;  %543 = vmin.xlane.f32.xlu1 %v518_v34 }
 0x15e   :  { %v1912_v35 = vpop.xlane.xlu1 %481 }
 0x15f   :  { %vm503_vm5 = vcmp.eq.f32.partialorder %v1818_v7, %v1912_v35 }
 0x160   :  { %v519_v36 = vsel %vm503_vm5, %v1885_v20, 128.0 }
 0x161   :  { %545 = vmin.xlane.f32.xlu2 %v519_v36 }
 0x164   :  { %v1917_v47 = vpop.xlane.xlu2 %483 }
 0x165   :  { %vm504_vm6 = vcmp.eq.f32.partialorder %v1833_v43, %v1917_v47 }
 0x166   :  { %v1921_v37 = vpop.xlane.xlu1 %467  ;;  %v520_v38 = vsel %vm504_vm6, %v1885_v20, 128.0 }
 0x167   :  { %547 = vmin.xlane.f32.xlu0 %v520_v38  ;;  %vm496_vm7 = vcmp.eq.f32.partialorder %v1836_v57, %v1921_v37 }
 0x168   :  { %v512_v39 = vsel %vm496_vm7, %v1885_v20, 128.0 }
 0x169   :  { %531 = vmin.xlane.f32.xlu1 %v512_v39 }
 0x16c   :  { %v1927_v40 = vpop.xlane.xlu2 %469  ;;  %v1929_v27 = vpop.xlane.xlu0 %485 }
 0x16d   :  { %vm497_vm8 = vcmp.eq.f32.partialorder %v1847_v14, %v1927_v40  ;;  %vm505_vm9 = vcmp.eq.f32.partialorder %v1849_v17, %v1929_v27 }
 0x16e   :  { %v513_v44 = vsel %vm497_vm8, %v1885_v20, 128.0  ;;  %v521_v33 = vsel %vm505_vm9, %v1885_v20, 128.0 }
 0x16f   :  { %533 = vmin.xlane.f32.xlu2 %v513_v44 }
 0x171   :  { %549 = vmin.xlane.f32.xlu1 %v521_v33 }
 0x174   :  { %v1937_v50 = vpop.xlane.xlu2 %471  ;;  %v1939_v52 = vpop.xlane.xlu1 %487 }
 0x175   :  { %vm498_vm10 = vcmp.eq.f32.partialorder %v1858_v41, %v1937_v50  ;;  %vm506_vm11 = vcmp.eq.f32.partialorder %v1860_v42, %v1939_v52 }
 0x176   :  { %v514_v59 = vsel %vm498_vm10, %v1885_v20, 128.0  ;;  %v522_v54 = vsel %vm506_vm11, %v1885_v20, 128.0 }
 0x177   :  { %v1947_v55 = vpop.xlane.xlu0 %473  ;;  %535 = vmin.xlane.f32.xlu0 %v514_v59  ;;  %551 = vmin.xlane.f32.xlu2 %v522_v54 }
 0x178   :  { %vm499_vm12 = vcmp.eq.f32.partialorder %v1864_v53, %v1947_v55 }
 0x179   :  { %v515_v56 = vsel %vm499_vm12, %v1885_v20, 128.0 }
 0x17a   :  { %537 = vmin.xlane.f32.xlu1 %v515_v56 }
 0x17e   :  { %v1952_v60 = vpop.xlane.xlu2 %489 }
 0x17f   :  { %v1954_v58 = vpop.xlane.xlu1 %475  ;;  %vm507_vm13 = vcmp.eq.f32.partialorder %v1871_v22, %v1952_v60 }
 0x180   :  { %2566 = vst [vmem:[#allocation21_spill] sm:$0xff] %v1954_v58  ;;  %v523_v61 = vsel %vm507_vm13, %v1885_v20, 128.0  ;;  %vm500_vm14 = vcmp.eq.f32.partialorder %v1874_v12, %v1954_v58 }
 0x181   :  { %553 = vmin.xlane.f32.xlu0 %v523_v61  ;;  %v516_v62 = vsel %vm500_vm14, %v1885_v20, 128.0 }
 0x182   :  { %539 = vmin.xlane.f32.xlu2 %v516_v62 }
 0x184   :  { %v1962_v63 = vpop.xlane.xlu0 %491 }
 0x185   :  { %2567 = vst [vmem:[#allocation22_spill] sm:$0xff] %v1962_v63  ;;  %vm508_vm15 = vcmp.eq.f32.partialorder %v1879_v23, %v1962_v63 }
 0x186   :  { %v524_v0 = vsel %vm508_vm15, %v1885_v20, 128.0 }
 0x187   :  { %555 = vmin.xlane.f32.xlu1 %v524_v0 }
 0x1bc   :  { %v1967_v1 = vpop.xlane.xlu1 %525 }
 0x1bd   :  { %vm557_vm0 = vcmp.eq.f32.partialorder %v1885_v20, %v1967_v1 }
 0x1be   :  { %v1975_v3 = vsel %vm557_vm0, -1e+30, %v1765_v45 }
 0x1bf   :  { %589 = vmax.xlane.f32.xlu2 %v1975_v3 }
 0x1c2   :  { %v1978_v6 = vpop.xlane.xlu0 %541 }
 0x1c3   :  { %vm565_vm1 = vcmp.eq.f32.partialorder %v1885_v20, %v1978_v6 }
 0x1c4   :  { %v1982_v16 = vpop.xlane.xlu2 %527  ;;  %v1988_v9 = vsel %vm565_vm1, -1e+30, %v1779_v5 }
 0x1c5   :  { %605 = vmax.xlane.f32.xlu1 %v1988_v9  ;;  %vm558_vm2 = vcmp.eq.f32.partialorder %v1885_v20, %v1982_v16 }
 0x1c6   :  { %v1997_v49 = vsel %vm558_vm2, -1e+30, %v1782_v15 }
 0x1c7   :  { %591 = vmax.xlane.f32.xlu0 %v1997_v49 }
 0x1cc   :  { %v2000_v10 = vpop.xlane.xlu1 %543  ;;  %v2002_v11 = vpop.xlane.xlu0 %529 }
 0x1cd   :  { %vm566_vm3 = vcmp.eq.f32.partialorder %v1885_v20, %v2000_v10  ;;  %vm559_vm4 = vcmp.eq.f32.partialorder %v1885_v20, %v2002_v11 }
 0x1ce   :  { %v2012_v8 = vsel %vm566_vm3, -1e+30, %v1801_v48  ;;  %v2018_v2 = vsel %vm559_vm4, -1e+30, %v1803_v51 }
 0x1cf   :  { %607 = vmax.xlane.f32.xlu2 %v2012_v8  ;;  %593 = vmax.xlane.f32.xlu1 %v2018_v2 }
 0x1d4   :  { %v2022_v13 = vpop.xlane.xlu2 %545 }
 0x1d5   :  { %vm567_vm5 = vcmp.eq.f32.partialorder %v1885_v20, %v2022_v13 }
 0x1d6   :  { %v2030_v18 = vsel %vm567_vm5, -1e+30, %v1818_v7 }
 0x1d7   :  { %609 = vmax.xlane.f32.xlu0 %v2030_v18 }
 0x1da   :  { %v2033_v19 = vpop.xlane.xlu0 %547 }
 0x1db   :  { %vm568_vm6 = vcmp.eq.f32.partialorder %v1885_v20, %v2033_v19 }
 0x1dc   :  { %v2037_v28 = vpop.xlane.xlu1 %531  ;;  %v2043_v30 = vsel %vm568_vm6, -1e+30, %v1833_v43 }
 0x1dd   :  { %611 = vmax.xlane.f32.xlu1 %v2043_v30  ;;  %vm560_vm7 = vcmp.eq.f32.partialorder %v1885_v20, %v2037_v28 }
 0x1de   :  { %v2052_v26 = vsel %vm560_vm7, -1e+30, %v1836_v57 }
 0x1df   :  { %595 = vmax.xlane.f32.xlu2 %v2052_v26 }
 0x1e2   :  { %v2055_v29 = vpop.xlane.xlu2 %533 }
 0x1e3   :  { %vm561_vm8 = vcmp.eq.f32.partialorder %v1885_v20, %v2055_v29 }
 0x1e4   :  { %v2059_v32 = vpop.xlane.xlu1 %549  ;;  %v2065_v34 = vsel %vm561_vm8, -1e+30, %v1847_v14 }
 0x1e5   :  { %597 = vmax.xlane.f32.xlu0 %v2065_v34  ;;  %vm2562_vm9 = vcmp.eq.f32.partialorder %v1885_v20, %v2059_v32 }
 0x1e6   :  { %v2074_v36 = vsel %vm2562_vm9, -1e+30, %v1849_v17  ;;  %vm1102_vm9 = vcmp.eq.s32.totalorder %v1882_v24, 1 }
 0x1e7   :  { %613 = vmax.xlane.f32.xlu2 %v2074_v36 }
 0x1ea   :  { %v2077_v38 = vpop.xlane.xlu2 %551  ;;  %v2079_v39 = vpop.xlane.xlu0 %535 }
 0x1eb   :  { %2568 = vst [vmem:[#allocation23_spill] sm:$0xff] %v2077_v38  ;;  %vm2546_vm10 = vcmp.eq.f32.partialorder %v1885_v20, %v2077_v38  ;;  %vm2561_vm11 = vcmp.eq.f32.partialorder %v1885_v20, %v2079_v39 }
 0x1ec   :  { %v2091_v33 = vsel %vm2546_vm10, -1e+30, %v1860_v42  ;;  %v2097_v59 = vsel %vm2561_vm11, -1e+30, %v1858_v41 }
 0x1ed   :  { %v2085_v44 = vpop.xlane.xlu1 %537  ;;  %615 = vmax.xlane.f32.xlu0 %v2091_v33  ;;  %599 = vmax.xlane.f32.xlu1 %v2097_v59 }
 0x1ee   :  { %2569 = vst [vmem:[#allocation24_spill] sm:$0xff] %v2085_v44  ;;  %vm2560_vm12 = vcmp.eq.f32.partialorder %v1885_v20, %v2085_v44 }
 0x1ef   :  { %v2107_v54 = vsel %vm2560_vm12, -1e+30, %v1864_v53 }
 0x1f0   :  { %601 = vmax.xlane.f32.xlu2 %v2107_v54 }
 0x1f4   :  { %v2110_v56 = vpop.xlane.xlu0 %553 }
 0x1f5   :  { %2570 = vst [vmem:[#allocation25_spill] sm:$0xff] %v2110_v56  ;;  %v2112_v61 = vpop.xlane.xlu2 %539  ;;  %vm2554_vm13 = vcmp.eq.f32.partialorder %v1885_v20, %v2110_v56 }
 0x1f6   :  { %2571 = vst [vmem:[#allocation26_spill] sm:$0xff] %v2112_v61  ;;  %v2120_v62 = vsel %vm2554_vm13, -1e+30, %v1871_v22  ;;  %vm2551_vm14 = vcmp.eq.f32.partialorder %v1885_v20, %v2112_v61 }
 0x1f7   :  { %617 = vmax.xlane.f32.xlu1 %v2120_v62  ;;  %v2129_v0 = vsel %vm2551_vm14, -1e+30, %v1874_v12 }
 0x1f8   :  { %603 = vmax.xlane.f32.xlu0 %v2129_v0 }
 0x1fa   :  { %v2132_v63 = vpop.xlane.xlu1 %555 }
 0x1fb   :  { %2572 = vst [vmem:[#allocation27_spill] sm:$0xff] %v2132_v63  ;;  %vm2559_vm15 = vcmp.eq.f32.partialorder %v1885_v20, %v2132_v63 }
 0x1fc   :  { %v2140_v56 = vsel %vm2559_vm15, -1e+30, %v1879_v23 }
 0x1fd   :  { %619 = vmax.xlane.f32.xlu2 %v2140_v56 }
 0x232   :  { %v590_v44 = vpop.xlane.xlu2 %589 }
 0x233   :  { %vm621_vm10 = vcmp.eq.f32.partialorder %v1975_v3, %v590_v44 }
 0x234   :  { %v637_v61 = vsel %vm621_vm10, %v1885_v20, 128.0 }
 0x235   :  { %653 = vmin.xlane.f32.xlu0 %v637_v61 }
 0x238   :  { %v606_v38 = vpop.xlane.xlu1 %605 }
 0x239   :  { %vm629_vm14 = vcmp.eq.f32.partialorder %v1988_v9, %v606_v38 }
 0x23a   :  { %v645_v12 = vsel %vm629_vm14, %v1885_v20, 128.0  ;;  %v592_v58 = vpop.xlane.xlu0 %591 }
 0x23b   :  { %669 = vmin.xlane.f32.xlu2 %v645_v12  ;;  %vm622_vm13 = vcmp.eq.f32.partialorder %v1997_v49, %v592_v58 }
 0x23c   :  { %v638_v63 = vsel %vm622_vm13, %v1885_v20, 128.0 }
 0x23d   :  { %655 = vmin.xlane.f32.xlu1 %v638_v63 }
 0x242   :  { %v608_v23 = vpop.xlane.xlu2 %607  ;;  %v594_v22 = vpop.xlane.xlu1 %593 }
 0x243   :  { %vm630_vm15 = vcmp.eq.f32.partialorder %v2012_v8, %v608_v23  ;;  %vm623_vm12 = vcmp.eq.f32.partialorder %v2018_v2, %v594_v22 }
 0x244   :  { %v646_v3 = vsel %vm630_vm15, %v1885_v20, 128.0  ;;  %v639_v44 = vsel %vm623_vm12, %v1885_v20, 128.0 }
 0x245   :  { %671 = vmin.xlane.f32.xlu0 %v646_v3  ;;  %657 = vmin.xlane.f32.xlu2 %v639_v44 }
 0x24a   :  { %v610_v9 = vpop.xlane.xlu0 %609 }
 0x24b   :  { %vm631_vm10 = vcmp.eq.f32.partialorder %v2030_v18, %v610_v9 }
 0x24c   :  { %v647_v12 = vsel %vm631_vm10, %v1885_v20, 128.0 }
 0x24d   :  { %673 = vmin.xlane.f32.xlu1 %v647_v12  ;;  %v717_v12 = vsub.f32 %v1765_v45, %v1887_v4  ;;  %v719_v45 = vsub.f32 %v1803_v51, %v1902_v31  ;;  %v1264_v4 = vfloor.f32 %v1978_v6  ;;  %v726_v51 = vsub.f32 %v1801_v48, %v1904_v46 }
 0x24e   :  { %v727_v31 = vsub.f32 %v1818_v7, %v1912_v35  ;;  %v728_v48 = vsub.f32 %v1833_v43, %v1917_v47 }
 0x24f   :  { %v737_v7 = vmul.f32 1.442695, %v719_v45 }
 0x250   :  { %v612_v58 = vpop.xlane.xlu1 %611  ;;  %v755_v47 = vmul.f32 1.442695, %v728_v48 }
 0x251   :  { %vm632_vm13 = vcmp.eq.f32.partialorder %v2043_v30, %v612_v58  ;;  %v733_v58 = vmul.f32 1.442695, %v717_v12  ;;  %v1268_v12 = vceil.f32 %v2000_v10 }
 0x252   :  { %v648_v63 = vsel %vm632_vm13, %v1885_v20, 128.0  ;;  %v596_v23 = vpop.xlane.xlu2 %595 }
 0x253   :  { %675 = vmin.xlane.f32.xlu2 %v648_v63  ;;  %vm624_vm14 = vcmp.eq.f32.partialorder %v2052_v26, %v596_v23  ;;  %v1223_v63 = vceil.f32 %v1967_v1  ;;  %1456 = vpow2.f32 %v733_v58  ;;  %v1233_v58 = vceil.f32 %v2002_v11 }
 0x254   :  { %v640_v22 = vsel %vm624_vm14, %v1885_v20, 128.0 }
 0x255   :  { %659 = vmin.xlane.f32.xlu0 %v640_v22 }
 0x258   :  { %v598_v49 = vpop.xlane.xlu0 %597 }
 0x259   :  { %vm625_vm12 = vcmp.eq.f32.partialorder %v2065_v34, %v598_v49 }
 0x25a   :  { %v641_v8 = vsel %vm625_vm12, %v1885_v20, 128.0  ;;  %v614_v2 = vpop.xlane.xlu2 %613 }
 0x25b   :  { %661 = vmin.xlane.f32.xlu1 %v641_v8  ;;  %vm633_vm15 = vcmp.eq.f32.partialorder %v2074_v36, %v614_v2  ;;  %v1228_v8 = vceil.f32 %v1982_v16  ;;  %v1229_v2 = vfloor.f32 %v1982_v16 }
 0x25c   :  { %v649_v18 = vsel %vm633_vm15, %v1885_v20, 128.0 }
 0x25d   :  { %677 = vmin.xlane.f32.xlu0 %v649_v18 }
 0x260   :  { %v600_v30 = vpop.xlane.xlu1 %599  ;;  %v616_v38 = vpop.xlane.xlu0 %615 }
 0x261   :  { %vm626_vm10 = vcmp.eq.f32.partialorder %v2097_v59, %v600_v30  ;;  %vm634_vm13 = vcmp.eq.f32.partialorder %v2091_v33, %v616_v38  ;;  %v1457_v30 = vpop.eup %1456 }
 0x262   :  { %v642_v26 = vsel %vm626_vm10, %v1885_v20, 128.0  ;;  %v650_v61 = vsel %vm634_vm13, %v1885_v20, 128.0  ;;  %vm1222_vm13 = vcmp.lt.s32.totalorder %v1967_v1, 0 }
 0x263   :  { %v602_v34 = vpop.xlane.xlu2 %601  ;;  %663 = vmin.xlane.f32.xlu2 %v642_v26  ;;  %679 = vmin.xlane.f32.xlu1 %v650_v61 }
 0x264   :  { %vm627_vm14 = vcmp.eq.f32.partialorder %v2107_v54, %v602_v34 }
 0x265   :  { %v643_v36 = vsel %vm627_vm14, %v1885_v20, 128.0  ;;  %vm1262_vm14 = vcmp.lt.s32.totalorder %v1978_v6, 0 }
 0x266   :  { %665 = vmin.xlane.f32.xlu0 %v643_v36  ;;  %v751_v36 = vmul.f32 1.442695, %v726_v51  ;;  %v721_v51 = vsub.f32 %v1847_v14, %v1927_v40 }
 0x26a   :  { %v618_v3 = vpop.xlane.xlu1 %617 }
 0x26b   :  { %vm635_vm12 = vcmp.eq.f32.partialorder %v2120_v62, %v618_v3  ;;  %v604_v44 = vpop.xlane.xlu0 %603  ;;  %v725_v62 = vsub.f32 %v1779_v5, %v1892_v21  ;;  %v1263_v5 = vceil.f32 %v1978_v6  ;;  %v753_v3 = vmul.f32 1.442695, %v727_v31 }
 0x26c   :  { %v651_v59 = vsel %vm635_vm12, %v1885_v20, 128.0  ;;  %vm628_vm15 = vcmp.eq.f32.partialorder %v2129_v0, %v604_v44  ;;  %v1224_v0 = vfloor.f32 %v1967_v1  ;;  %v1274_v31 = vfloor.f32 %v2022_v13 }
 0x26d   :  { %681 = vmin.xlane.f32.xlu2 %v651_v59  ;;  %v644_v33 = vsel %vm628_vm15, %v1885_v20, 128.0  ;;  %v749_v23 = vmul.f32 1.442695, %v725_v62  ;;  %v1265_v38 = vsel %vm1262_vm14, %v1263_v5, %v1264_v4  ;;  %v1269_v62 = vfloor.f32 %v2000_v10 }
 0x26e   :  { %667 = vmin.xlane.f32.xlu1 %v644_v33  ;;  %v1225_v22 = vsel %vm1222_vm13, %v1223_v63, %v1224_v0  ;;  %vm1227_vm13 = vcmp.lt.s32.totalorder %v1982_v16, 0  ;;  %v1266_v44 = vcvt.f32.s32 %v1265_v38  ;;  %v1234_v63 = vfloor.f32 %v2002_v11 }
 0x26f   :  { %1458 = vpow2.f32 %v749_v23  ;;  %v1226_v21 = vcvt.f32.s32 %v1225_v22  ;;  %v1230_v1 = vsel %vm1227_vm13, %v1228_v8, %v1229_v2  ;;  %v720_v8 = vsub.f32 %v1836_v57, %v1921_v37 }
 0x270   :  { %v620_v9 = vpop.xlane.xlu2 %619  ;;  %v729_v57 = vsub.f32 %v1849_v17, %v1929_v27  ;;  %v1273_v37 = vceil.f32 %v2022_v13 }
 0x271   :  { %vm636_vm10 = vcmp.eq.f32.partialorder %v2140_v56, %v620_v9  ;;  %v718_v56 = vsub.f32 %v1782_v15, %v1896_v25  ;;  %v739_v38 = vmul.f32 1.442695, %v720_v8 }
 0x272   :  { %v652_v54 = vsel %vm636_vm10, %v1885_v20, 128.0  ;;  %vm1069_vm10 = vcmp.eq.s32.totalorder %v1882_v24, 0 }
 0x273   :  { %683 = vmin.xlane.f32.xlu0 %v652_v54  ;;  %v735_v49 = vmul.f32 1.442695, %v718_v56  ;;  %v1086_v35 = vsel %vm1069_vm10, %v1226_v21, 0  ;;  %v1231_v54 = vcvt.f32.s32 %v1230_v1  ;;  %v1094_v4 = vsel %vm1069_vm10, %v1266_v44, 0 }
 0x275   :  { %v1459_v34 = vpop.eup %1458  ;;  %1460 = vpow2.f32 %v735_v49 }
 0x276   :  { %1462 = vpow2.f32 %v737_v7 }
 0x277   :  { %1464 = vpow2.f32 %v751_v36  ;;  %v741_v36 = vmul.f32 1.442695, %v721_v51 }
 0x278   :  { %1466 = vpow2.f32 %v753_v3  ;;  %v757_v3 = vmul.f32 1.442695, %v729_v57 }
 0x279   :  { %1468 = vpow2.f32 %v755_v47 }
 0x27a   :  { %1470 = vpow2.f32 %v739_v38 }
 0x27b   :  { %v1461_v5 = vpop.eup %1460  ;;  %1472 = vpow2.f32 %v741_v36 }
 0x27c   :  { %v1463_v7 = vpop.eup %1462  ;;  %1474 = vpow2.f32 %v757_v3 }
 0x27d   :  { %v1465_v14 = vpop.eup %1464 }
 0x27e   :  { %v1467_v27 = vpop.eup %1466 }
 0x2a8   :  { %v654_v18 = vpop.xlane.xlu0 %653 }
 0x2a9   :  { %vm1302_vm12 = vcmp.lt.s32.totalorder %v654_v18, 0  ;;  %v1303_v15 = vceil.f32 %v654_v18  ;;  %v1304_v25 = vfloor.f32 %v654_v18  ;;  %vm685_vm15 = vcmp.eq.f32.partialorder %v1885_v20, %v654_v18 }
 0x2aa   :  { %vm701_vm11 = vmor %vm557_vm0, %vm685_vm15  ;;  %vm1232_vm15 = vcmp.lt.s32.totalorder %v2002_v11, 0 }
 0x2ab   :  { %v1305_v26 = vsel %vm1302_vm12, %v1303_v15, %v1304_v25  ;;  %v2202_v61 = vsel %vm701_vm11, %v1457_v30, 0.0  ;;  %v1087_v15 = vsel %vm1069_vm10, %v1231_v54, 0  ;;  %v1235_v30 = vsel %vm1232_vm15, %v1233_v58, %v1234_v63 }
 0x2ac   :  { %v1306_v46 = vcvt.f32.s32 %v1305_v26  ;;  %781 = vadd.xlane.f32.xlu1 %v2202_v61  ;;  %v1279_v63 = vfloor.f32 %v2033_v19 }
 0x2ae   :  { %v1119_v59 = vsel %vm1102_vm9, %v1306_v46, %v1086_v35  ;;  %v670_v33 = vpop.xlane.xlu2 %669 }
 0x2af   :  { %1135 = vst [vmem:[#allocation11] sm:$0xff] %v1119_v59  ;;  %vm1342_vm0 = vcmp.lt.s32.totalorder %v670_v33, 0  ;;  %v1343_v9 = vceil.f32 %v670_v33  ;;  %v1344_v43 = vfloor.f32 %v670_v33  ;;  %vm693_vm11 = vcmp.eq.f32.partialorder %v1885_v20, %v670_v33  ;;  %v2255_v33 = vpop.eup %1468 }
 0x2b0   :  { %vm709_vm14 = vmor %vm565_vm1, %vm693_vm11  ;;  %v656_v23 = vpop.xlane.xlu1 %655  ;;  %vm1267_vm1 = vcmp.lt.s32.totalorder %v2000_v10, 0 }
 0x2b1   :  { %v1345_v0 = vsel %vm1342_vm0, %v1343_v9, %v1344_v43  ;;  %v2219_v56 = vsel %vm709_vm14, %v1459_v34, 0.0  ;;  %vm1307_vm12 = vcmp.lt.s32.totalorder %v656_v23, 0  ;;  %v1308_v49 = vceil.f32 %v656_v23 }
 0x2b2   :  { %v1346_v22 = vcvt.f32.s32 %v1345_v0  ;;  %v1309_v45 = vfloor.f32 %v656_v23  ;;  %797 = vadd.xlane.f32.xlu0 %v2219_v56  ;;  %vm686_vm13 = vcmp.eq.f32.partialorder %v1885_v20, %v656_v23  ;;  %v1270_v25 = vsel %vm1267_vm1, %v1268_v12, %v1269_v62 }
 0x2b3   :  { %vm702_vm0 = vmor %vm558_vm2, %vm686_vm13  ;;  %v1271_v26 = vcvt.f32.s32 %v1270_v25  ;;  %v1236_v34 = vcvt.f32.s32 %v1235_v30  ;;  %vm1272_vm2 = vcmp.lt.s32.totalorder %v2022_v13, 0  ;;  %v722_v9 = vsub.f32 %v1858_v41, %v1937_v50 }
 0x2b4   :  { %v1127_v6 = vsel %vm1102_vm9, %v1346_v22, %v1094_v4  ;;  %v1310_v21 = vsel %vm1307_vm12, %v1308_v49, %v1309_v45  ;;  %v2234_v18 = vsel %vm702_vm0, %v1461_v5, 0.0  ;;  %v1275_v44 = vsel %vm1272_vm2, %v1273_v37, %v1274_v31 }
 0x2b5   :  { %1143 = vst [vmem:[#allocation11 + $0x40] sm:$0xff] %v1127_v6  ;;  %v1311_v2 = vcvt.f32.s32 %v1310_v21  ;;  %783 = vadd.xlane.f32.xlu2 %v2234_v18  ;;  %v1095_v12 = vsel %vm1069_vm10, %v1271_v26, 0  ;;  %v1088_v11 = vsel %vm1069_vm10, %v1236_v34, 0  ;;  %v1276_v41 = vcvt.f32.s32 %v1275_v44  ;;  %v1471_v26 = vpop.eup %1470 }
 0x2b6   :  { %v1278_v50 = vceil.f32 %v2033_v19  ;;  %v1238_v0 = vceil.f32 %v2037_v28  ;;  %v1239_v23 = vfloor.f32 %v2037_v28  ;;  %v743_v4 = vmul.f32 1.442695, %v722_v9 }
 0x2b7   :  { %v1120_v16 = vsel %vm1102_vm9, %v1311_v2, %v1087_v15  ;;  %v723_v6 = vsub.f32 %v1864_v53, %v1947_v55  ;;  %vm1237_vm2 = vcmp.lt.s32.totalorder %v2037_v28, 0  ;;  %v1243_v15 = vceil.f32 %v2055_v29 }
 0x2b8   :  { %1136 = vst [vmem:[#allocation11 + $0x8] sm:$0xff] %v1120_v16  ;;  %v658_v48 = vpop.xlane.xlu2 %657  ;;  %v672_v46 = vpop.xlane.xlu0 %671  ;;  %v1244_v25 = vfloor.f32 %v2055_v29  ;;  %v730_v53 = vsub.f32 %v1860_v42, %v1939_v52  ;;  %v1096_v55 = vsel %vm1069_vm10, %v1276_v41, 0  ;;  %v1240_v13 = vsel %vm1237_vm2, %v1238_v0, %v1239_v23  ;;  %v2576_v23 = vld [vmem:[#allocation23_spill] sm:$0xff] }
 0x2b9   :  { %vm1312_vm11 = vcmp.lt.s32.totalorder %v658_v48, 0  ;;  %v1313_v35 = vceil.f32 %v658_v48  ;;  %v1314_v1 = vfloor.f32 %v658_v48  ;;  %vm1347_vm14 = vcmp.lt.s32.totalorder %v672_v46, 0 }
 0x2ba   :  { %v1348_v40 = vceil.f32 %v672_v46  ;;  %v1349_v17 = vfloor.f32 %v672_v46  ;;  %vm687_vm12 = vcmp.eq.f32.partialorder %v1885_v20, %v658_v48  ;;  %vm694_vm1 = vcmp.eq.f32.partialorder %v1885_v20, %v672_v46 }
 0x2bb   :  { %v1315_v59 = vsel %vm1312_vm11, %v1313_v35, %v1314_v1  ;;  %vm703_vm15 = vmor %vm559_vm4, %vm687_vm12  ;;  %1476 = vpow2.f32 %v743_v4  ;;  %v2300_v16 = vmul.f32 1.442695, %v723_v6  ;;  %v1241_v34 = vcvt.f32.s32 %v1240_v13  ;;  %v1473_v35 = vpop.eup %1472 }
 0x2bc   :  { %v1316_v43 = vcvt.f32.s32 %v1315_v59  ;;  %v1350_v47 = vsel %vm1347_vm14, %v1348_v40, %v1349_v17  ;;  %v2259_v54 = vsel %vm703_vm15, %v1463_v7, 0.0  ;;  %vm710_vm13 = vmor %vm566_vm3, %vm694_vm1  ;;  %vm1277_vm3 = vcmp.lt.s32.totalorder %v2033_v19, 0  ;;  %v1475_v36 = vpop.eup %1474 }
 0x2bd   :  { %v1351_v62 = vcvt.f32.s32 %v1350_v47  ;;  %785 = vadd.xlane.f32.xlu0 %v2259_v54  ;;  %v2269_v58 = vsel %vm710_vm13, %v1465_v14, 0.0  ;;  %v1280_v21 = vsel %vm1277_vm3, %v1278_v50, %v1279_v63  ;;  %v1283_v46 = vceil.f32 %v2059_v32  ;;  %v2574_v47 = vld [vmem:[#allocation21_spill] sm:$0xff] }
 0x2be   :  { %v1121_v10 = vsel %vm1102_vm9, %v1316_v43, %v1088_v11  ;;  %799 = vadd.xlane.f32.xlu1 %v2269_v58  ;;  %v1281_v51 = vcvt.f32.s32 %v1280_v21  ;;  %v1284_v7 = vfloor.f32 %v2059_v32  ;;  %v1248_v1 = vceil.f32 %v2079_v39  ;;  %v2577_v21 = vld [vmem:[#allocation24_spill] sm:$0xff] }
 0x2bf   :  { %1137 = vst [vmem:[#allocation11 + $0x10] sm:$0xff] %v1121_v10  ;;  %v1128_v22 = vsel %vm1102_vm9, %v1351_v62, %v1095_v12  ;;  %v1249_v14 = vfloor.f32 %v2079_v39  ;;  %vm1247_vm13 = vcmp.lt.s32.totalorder %v2079_v39, 0  ;;  %v2575_v12 = vld [vmem:[#allocation19_spill] sm:$0xff]  ;;  %v1089_v50 = vsel %vm1069_vm10, %v1241_v34, 0 }
 0x2c0   :  { %v674_v49 = vpop.xlane.xlu1 %673  ;;  %1144 = vst [vmem:[#allocation11 + $0x48] sm:$0xff] %v1128_v22  ;;  %v1097_v19 = vsel %vm1069_vm10, %v1281_v51, 0  ;;  %v724_v11 = vsub.f32 %v2575_v12, %v2574_v47  ;;  %v1288_v22 = vceil.f32 %v2576_v23  ;;  %1478 = vpow2.f32 %v2300_v16 }
 0x2c1   :  { %vm1352_vm4 = vcmp.lt.s32.totalorder %v674_v49, 0  ;;  %v1353_v45 = vceil.f32 %v674_v49  ;;  %v1354_v5 = vfloor.f32 %v674_v49  ;;  %vm695_vm0 = vcmp.eq.f32.partialorder %v1885_v20, %v674_v49  ;;  %v2321_v9 = vpop.eup %1476 }
 0x2c2   :  { %vm711_vm11 = vmor %vm567_vm5, %vm695_vm0  ;;  %vm1242_vm5 = vcmp.lt.s32.totalorder %v2055_v29, 0  ;;  %v1289_v49 = vfloor.f32 %v2576_v23  ;;  %vm1287_vm0 = vcmp.lt.s32.totalorder %v2576_v23, 0 }
 0x2c3   :  { %v1355_v8 = vsel %vm1352_vm4, %v1353_v45, %v1354_v5  ;;  %v2290_v2 = vsel %vm711_vm11, %v1467_v27, 0.0  ;;  %v1245_v48 = vsel %vm1242_vm5, %v1243_v15, %v1244_v25  ;;  %v1250_v45 = vsel %vm1247_vm13, %v1248_v1, %v1249_v14  ;;  %v2579_v14 = vld [vmem:[#allocation22_spill] sm:$0xff] }
 0x2c4   :  { %v1356_v30 = vcvt.f32.s32 %v1355_v8  ;;  %801 = vadd.xlane.f32.xlu2 %v2290_v2  ;;  %v1246_v63 = vcvt.f32.s32 %v1245_v48  ;;  %v1253_v8 = vceil.f32 %v2577_v21  ;;  %v1254_v15 = vfloor.f32 %v2577_v21 }
 0x2c5   :  { %vm1252_vm11 = vcmp.lt.s32.totalorder %v2577_v21, 0 }
 0x2c6   :  { %v1129_v57 = vsel %vm1102_vm9, %v1356_v30, %v1096_v55  ;;  %v676_v37 = vpop.xlane.xlu2 %675  ;;  %v1251_v30 = vcvt.f32.s32 %v1250_v45  ;;  %v1255_v34 = vsel %vm1252_vm11, %v1253_v8, %v1254_v15 }
 0x2c7   :  { %1145 = vst [vmem:[#allocation11 + $0x50] sm:$0xff] %v1129_v57  ;;  %vm1357_vm14 = vcmp.lt.s32.totalorder %v676_v37, 0  ;;  %v1358_v31 = vceil.f32 %v676_v37  ;;  %v1359_v38 = vfloor.f32 %v676_v37  ;;  %vm696_vm12 = vcmp.eq.f32.partialorder %v1885_v20, %v676_v37 }
 0x2c8   :  { %vm712_vm1 = vmor %vm568_vm6, %vm696_vm12  ;;  %v660_v17 = vpop.xlane.xlu0 %659  ;;  %vm1282_vm6 = vcmp.lt.s32.totalorder %v2059_v32, 0 }
 0x2c9   :  { %v1360_v40 = vsel %vm1357_vm14, %v1358_v31, %v1359_v38  ;;  %v2313_v27 = vsel %vm712_vm1, %v2255_v33, 0.0  ;;  %vm1317_vm15 = vcmp.lt.s32.totalorder %v660_v17, 0  ;;  %v1318_v44 = vceil.f32 %v660_v17  ;;  %v2573_v33 = vld [vmem:[#allocation18_spill] sm:$0xff] }
 0x2ca   :  { %v1361_v3 = vcvt.f32.s32 %v1360_v40  ;;  %v1319_v59 = vfloor.f32 %v660_v17  ;;  %803 = vadd.xlane.f32.xlu0 %v2313_v27  ;;  %vm688_vm3 = vcmp.eq.f32.partialorder %v1885_v20, %v660_v17  ;;  %v731_v43 = vsub.f32 %v2573_v33, %v1952_v60  ;;  %v2580_v40 = vld [vmem:[#allocation20_spill] sm:$0xff] }
 0x2cb   :  { %vm704_vm4 = vmor %vm560_vm7, %vm688_vm3  ;;  %v1285_v60 = vsel %vm1282_vm6, %v1283_v46, %v1284_v7  ;;  %v1090_v31 = vsel %vm1069_vm10, %v1246_v63, 0  ;;  %v1290_v38 = vsel %vm1287_vm0, %v1288_v22, %v1289_v49  ;;  %v747_v7 = vmul.f32 1.442695, %v724_v11  ;;  %v2582_v63 = vld [vmem:[#allocation26_spill] sm:$0xff] }
 0x2cc   :  { %v1130_v62 = vsel %vm1102_vm9, %v1361_v3, %v1097_v19  ;;  %v1320_v41 = vsel %vm1317_vm15, %v1318_v44, %v1319_v59  ;;  %v2334_v0 = vsel %vm704_vm4, %v1471_v26, 0.0  ;;  %v1286_v25 = vcvt.f32.s32 %v1285_v60  ;;  %v2581_v59 = vld [vmem:[#allocation25_spill] sm:$0xff] }
 0x2cd   :  { %1146 = vst [vmem:[#allocation11 + $0x58] sm:$0xff] %v1130_v62  ;;  %v1321_v10 = vcvt.f32.s32 %v1320_v41  ;;  %787 = vadd.xlane.f32.xlu1 %v2334_v0  ;;  %v761_v46 = vmul.f32 1.442695, %v731_v43  ;;  %v732_v16 = vsub.f32 %v2580_v40, %v2579_v14  ;;  %v1291_v3 = vcvt.f32.s32 %v1290_v38 }
 0x2ce   :  { %v662_v28 = vpop.xlane.xlu1 %661  ;;  %v1098_v17 = vsel %vm1069_vm10, %v1286_v25, 0  ;;  %v1091_v44 = vsel %vm1069_vm10, %v1251_v30, 0  ;;  %vm1292_vm15 = vcmp.lt.s32.totalorder %v2581_v59, 0  ;;  %v1293_v19 = vceil.f32 %v2581_v59 }
 0x2cf   :  { %v1122_v5 = vsel %vm1102_vm9, %v1321_v10, %v1089_v50  ;;  %vm1322_vm7 = vcmp.lt.s32.totalorder %v662_v28, 0  ;;  %v1323_v4 = vceil.f32 %v662_v28  ;;  %v1324_v6 = vfloor.f32 %v662_v28  ;;  %v1479_v50 = vpop.eup %1478 }
 0x2d0   :  { %1138 = vst [vmem:[#allocation11 + $0x18] sm:$0xff] %v1122_v5  ;;  %vm689_vm2 = vcmp.eq.f32.partialorder %v1885_v20, %v662_v28  ;;  %v678_v13 = vpop.xlane.xlu0 %677  ;;  %v1294_v11 = vfloor.f32 %v2581_v59  ;;  %vm1257_vm4 = vcmp.lt.s32.totalorder %v2582_v63, 0  ;;  %v1258_v10 = vceil.f32 %v2582_v63 }
 0x2d1   :  { %v1325_v55 = vsel %vm1322_vm7, %v1323_v4, %v1324_v6  ;;  %vm705_vm5 = vmor %vm561_vm8, %vm689_vm2  ;;  %vm1362_vm14 = vcmp.lt.s32.totalorder %v678_v13, 0  ;;  %v1363_v57 = vceil.f32 %v678_v13  ;;  %v1364_v37 = vfloor.f32 %v678_v13 }
 0x2d2   :  { %v1326_v51 = vcvt.f32.s32 %v1325_v55  ;;  %v2355_v26 = vsel %vm705_vm5, %v1473_v35, 0.0  ;;  %vm697_vm12 = vcmp.eq.f32.partialorder %v1885_v20, %v678_v13  ;;  %vm2578_vm8 = vcmp.eq.f32.partialorder %v1885_v20, %v2059_v32 }
 0x2d3   :  { %v1365_v48 = vsel %vm1362_vm14, %v1363_v57, %v1364_v37  ;;  %789 = vadd.xlane.f32.xlu2 %v2355_v26  ;;  %vm713_vm1 = vmor %vm2578_vm8, %vm697_vm12  ;;  %v1256_v32 = vcvt.f32.s32 %v1255_v34  ;;  %v1259_v60 = vfloor.f32 %v2582_v63  ;;  %vm2583_vm7 = vcmp.eq.f32.partialorder %v1885_v20, %v2079_v39 }
 0x2d4   :  { %v1123_v29 = vsel %vm1102_vm9, %v1326_v51, %v1090_v31  ;;  %v1366_v35 = vcvt.f32.s32 %v1365_v48  ;;  %v2365_v1 = vsel %vm713_vm1, %v1475_v36, 0.0  ;;  %1480 = vpow2.f32 %v761_v46  ;;  %v2585_v31 = vld [vmem:[#allocation27_spill] sm:$0xff] }
 0x2d5   :  { %1139 = vst [vmem:[#allocation11 + $0x20] sm:$0xff] %v1123_v29  ;;  %805 = vadd.xlane.f32.xlu1 %v2365_v1  ;;  %v1099_v15 = vsel %vm1069_vm10, %v1291_v3, 0  ;;  %v1295_v25 = vsel %vm1292_vm15, %v1293_v19, %v1294_v11  ;;  %vm2584_vm5 = vcmp.eq.f32.partialorder %v1885_v20, %v2577_v21  ;;  %1482 = vpow2.f32 %v747_v7 }
 0x2d6   :  { %v1131_v36 = vsel %vm1102_vm9, %v1366_v35, %v1098_v17  ;;  %v664_v33 = vpop.xlane.xlu2 %663  ;;  %v2378_v43 = vpop.xlane.xlu1 %679  ;;  %v1092_v51 = vsel %vm1069_vm10, %v1256_v32, 0  ;;  %v1260_v57 = vsel %vm1257_vm4, %v1258_v10, %v1259_v60  ;;  %v1296_v21 = vcvt.f32.s32 %v1295_v25 }
 0x2d7   :  { %1147 = vst [vmem:[#allocation11 + $0x60] sm:$0xff] %v1131_v36  ;;  %vm1327_vm6 = vcmp.lt.s32.totalorder %v664_v33, 0  ;;  %v1328_v47 = vceil.f32 %v664_v33  ;;  %v1329_v12 = vfloor.f32 %v664_v33  ;;  %vm1367_vm13 = vcmp.lt.s32.totalorder %v2378_v43, 0 }
 0x2d8   :  { %v1368_v62 = vceil.f32 %v2378_v43  ;;  %v1369_v41 = vfloor.f32 %v2378_v43  ;;  %vm690_vm3 = vcmp.eq.f32.partialorder %v1885_v20, %v664_v33  ;;  %vm1297_vm12 = vcmp.lt.s32.totalorder %v2585_v31, 0 }
 0x2d9   :  { %v1330_v22 = vsel %vm1327_vm6, %v1328_v47, %v1329_v12  ;;  %v666_v49 = vpop.xlane.xlu0 %665  ;;  %vm706_vm0 = vmor %vm2583_vm7, %vm690_vm3  ;;  %v1298_v38 = vceil.f32 %v2585_v31  ;;  %v1299_v34 = vfloor.f32 %v2585_v31  ;;  %v759_v35 = vmul.f32 1.442695, %v730_v53 }
 0x2da   :  { %v1331_v45 = vcvt.f32.s32 %v1330_v22  ;;  %v1370_v28 = vsel %vm1367_vm13, %v1368_v62, %v1369_v41  ;;  %vm1332_vm2 = vcmp.lt.s32.totalorder %v666_v49, 0  ;;  %v1333_v5 = vceil.f32 %v666_v49 }
 0x2db   :  { %v1371_v4 = vcvt.f32.s32 %v1370_v28  ;;  %v1334_v6 = vfloor.f32 %v666_v49  ;;  %v2392_v8 = vsel %vm706_vm0, %v2321_v9, 0.0  ;;  %vm691_vm11 = vcmp.eq.f32.partialorder %v1885_v20, %v666_v49 }
 0x2dc   :  { %v1124_v39 = vsel %vm1102_vm9, %v1331_v45, %v1091_v44  ;;  %791 = vadd.xlane.f32.xlu0 %v2392_v8  ;;  %vm707_vm14 = vmor %vm2584_vm5, %vm691_vm11  ;;  %v763_v9 = vmul.f32 1.442695, %v732_v16  ;;  %v1261_v14 = vcvt.f32.s32 %v1260_v57  ;;  %v1481_v16 = vpop.eup %1480  ;;  %vm2586_vm6 = vcmp.eq.f32.partialorder %v1885_v20, %v2581_v59 }
 0x2dd   :  { %1140 = vst [vmem:[#allocation11 + $0x28] sm:$0xff] %v1124_v39  ;;  %v1132_v30 = vsel %vm1102_vm9, %v1371_v4, %v1099_v15  ;;  %v1335_v55 = vsel %vm1332_vm2, %v1333_v5, %v1334_v6  ;;  %v2407_v13 = vsel %vm707_vm14, %v1479_v50, 0.0  ;;  %v1300_v32 = vsel %vm1297_vm12, %v1298_v38, %v1299_v34  ;;  %v1483_v53 = vpop.eup %1482 }
 0x2de   :  { %1148 = vst [vmem:[#allocation11 + $0x68] sm:$0xff] %v1132_v30  ;;  %v1336_v37 = vcvt.f32.s32 %v1335_v55  ;;  %793 = vadd.xlane.f32.xlu1 %v2407_v13  ;;  %1484 = vpow2.f32 %v763_v9  ;;  %v1100_v19 = vsel %vm1069_vm10, %v1296_v21, 0  ;;  %vm2587_vm4 = vcmp.eq.f32.partialorder %v1885_v20, %v2582_v63 }
 0x2df   :  { %1486 = vpow2.f32 %v759_v35  ;;  %v1093_v12 = vsel %vm1069_vm10, %v1261_v14, 0  ;;  %v1301_v11 = vcvt.f32.s32 %v1300_v32  ;;  %vm698_vm0 = vcmp.eq.f32.partialorder %v1885_v20, %v2378_v43 }
 0x2e0   :  { %v682_v29 = vpop.xlane.xlu2 %681  ;;  %v1125_v48 = vsel %vm1102_vm9, %v1336_v37, %v1092_v51  ;;  %vm2588_vm5 = vcmp.eq.f32.partialorder %v1885_v20, %v2585_v31  ;;  %vm2589_vm12 = vcmp.eq.f32.partialorder %v1885_v20, %v2576_v23 }
 0x2e1   :  { %vm1372_vm8 = vcmp.lt.s32.totalorder %v682_v29, 0  ;;  %v1373_v46 = vceil.f32 %v682_v29  ;;  %v1374_v7 = vfloor.f32 %v682_v29  ;;  %1141 = vst [vmem:[#allocation11 + $0x30] sm:$0xff] %v1125_v48  ;;  %v668_v40 = vpop.xlane.xlu1 %667  ;;  %vm699_vm1 = vcmp.eq.f32.partialorder %v1885_v20, %v682_v29 }
 0x2e2   :  { %vm1337_vm15 = vcmp.lt.s32.totalorder %v668_v40, 0  ;;  %v1338_v3 = vceil.f32 %v668_v40  ;;  %v1339_v44 = vfloor.f32 %v668_v40  ;;  %vm715_vm13 = vmor %vm2586_vm6, %vm699_vm1  ;;  %vm692_vm3 = vcmp.eq.f32.partialorder %v1885_v20, %v668_v40 }
 0x2e3   :  { %v1375_v17 = vsel %vm1372_vm8, %v1373_v46, %v1374_v7  ;;  %v2428_v52 = vsel %vm715_vm13, %v1481_v16, 0.0  ;;  %vm708_vm7 = vmor %vm2587_vm4, %vm692_vm3  ;;  %v1101_v43 = vsel %vm1069_vm10, %v1301_v11, 0 }
 0x2e4   :  { %v1376_v42 = vcvt.f32.s32 %v1375_v17  ;;  %v1340_v36 = vsel %vm1337_vm15, %v1338_v3, %v1339_v44  ;;  %809 = vadd.xlane.f32.xlu0 %v2428_v52  ;;  %v2439_v47 = vsel %vm708_vm7, %v1483_v53, 0.0  ;;  %v1485_v41 = vpop.eup %1484  ;;  %vm714_vm8 = vmor %vm2589_vm12, %vm698_vm0 }
 0x2e5   :  { %v1341_v33 = vcvt.f32.s32 %v1340_v36  ;;  %795 = vadd.xlane.f32.xlu2 %v2439_v47  ;;  %v1487_v45 = vpop.eup %1486 }
 0x2e6   :  { %v1133_v59 = vsel %vm1102_vm9, %v1376_v42, %v1100_v19  ;;  %v684_v62 = vpop.xlane.xlu0 %683  ;;  %v2462_v5 = vsel %vm714_vm8, %v1487_v45, 0.0 }
 0x2e7   :  { %1149 = vst [vmem:[#allocation11 + $0x70] sm:$0xff] %v1133_v59  ;;  %v1126_v50 = vsel %vm1102_vm9, %v1341_v33, %v1093_v12  ;;  %vm1377_vm2 = vcmp.lt.s32.totalorder %v684_v62, 0  ;;  %v1378_v63 = vceil.f32 %v684_v62  ;;  %v1379_v10 = vfloor.f32 %v684_v62 }
 0x2e8   :  { %1142 = vst [vmem:[#allocation11 + $0x38] sm:$0xff] %v1126_v50  ;;  %vm700_vm11 = vcmp.eq.f32.partialorder %v1885_v20, %v684_v62 }
 0x2e9   :  { %v1380_v60 = vsel %vm1377_vm2, %v1378_v63, %v1379_v10  ;;  %vm716_vm14 = vmor %vm2588_vm5, %vm700_vm11 }
 0x2ea   :  { %v1381_v22 = vcvt.f32.s32 %v1380_v60  ;;  %v2452_v49 = vsel %vm716_vm14, %v1485_v41, 0.0 }
 0x2eb   :  { %811 = vadd.xlane.f32.xlu1 %v2452_v49 }
 0x2ec   :  { %v1134_v28 = vsel %vm1102_vm9, %v1381_v22, %v1101_v43 }
 0x2ed   :  { %1150 = vst [vmem:[#allocation11 + $0x78] sm:$0xff] %v1134_v28  ;;  %807 = vadd.xlane.f32.xlu2 %v2462_v5 }
 0x2ee   :  { %1176 = dma.vmem_to_hbm [thread:$0]  %s1169_s3, 2048, %s1171_s17, [#allocation12], %s1678_s30, %s1678_s30, %s1679_s6  }
 0x31f   :  { %v782_v20 = vpop.xlane.xlu1 %781 }
 0x320   :  { %1488 = vrcp.f32 %v782_v20  ;;  %v824_v25 = vand.u32 2147483648, %v782_v20  ;;  %v822_v9 = vand.u32 2147483647, %v782_v20  ;;  %vm818_vm10 = vweird.f32 %v782_v20 }
 0x322   :  { %v825_v57 = vor.u32 1.1754944e-38, %v824_v25  ;;  %vm823_vm15 = vcmp.eq.f32.partialorder %v822_v9, 8.507059e+37 }
 0x325   :  { %v798_v24 = vpop.xlane.xlu0 %797 }
 0x326   :  { %v1489_v23 = vpop.eup %1488  ;;  %1490 = vrcp.f32 %v798_v24  ;;  %v942_v34 = vand.u32 2147483647, %v798_v24  ;;  %v944_v29 = vand.u32 2147483648, %v798_v24  ;;  %vm938_vm13 = vweird.f32 %v798_v24 }
 0x327   :  { %v814_v4 = vmul.f32 %v1489_v23, %v782_v20  ;;  %vm819_vm9 = vweird.f32 %v1489_v23 }
 0x328   :  { %v784_v15 = vpop.xlane.xlu2 %783  ;;  %vm820_vm1 = vmor %vm818_vm10, %vm819_vm9  ;;  %vm943_vm4 = vcmp.eq.f32.partialorder %v942_v34, 8.507059e+37  ;;  %v945_v17 = vor.u32 1.1754944e-38, %v944_v29 }
 0x329   :  { %v815_v6 = vsub.f32 1.0, %v814_v4  ;;  %1492 = vrcp.f32 %v784_v15  ;;  %v839_v3 = vand.u32 2147483648, %v784_v15  ;;  %v837_v42 = vand.u32 2147483647, %v784_v15 }
 0x32a   :  { %vm833_vm0 = vweird.f32 %v784_v15 }
 0x32b   :  { %v816_v39 = vmul.f32 %v1489_v23, %v815_v6  ;;  %v840_v33 = vor.u32 1.1754944e-38, %v839_v3  ;;  %vm838_vm11 = vcmp.eq.f32.partialorder %v837_v42, 8.507059e+37 }
 0x32c   :  { %v1491_v30 = vpop.eup %1490 }
 0x32d   :  { %v817_v55 = vadd.f32 %v1489_v23, %v816_v39  ;;  %v934_v51 = vmul.f32 %v1491_v30, %v798_v24  ;;  %vm939_vm6 = vweird.f32 %v1491_v30 }
 0x32e   :  { %vm940_vm3 = vmor %vm938_vm13, %vm939_vm6 }
 0x32f   :  { %v821_v37 = vsel %vm820_vm1, %v1489_v23, %v817_v55  ;;  %v935_v21 = vsub.f32 1.0, %v934_v51  ;;  %v1493_v31 = vpop.eup %1492 }
 0x330   :  { %v826_v38 = vsel %vm823_vm15, %v825_v57, %v821_v37  ;;  %v829_v7 = vmul.f32 %v1493_v31, %v784_v15  ;;  %v786_v35 = vpop.xlane.xlu0 %785  ;;  %vm834_vm7 = vweird.f32 %v1493_v31 }
 0x331   :  { %v827_v48 = vmul.f32 %v826_v38, %v2202_v61  ;;  %v936_v46 = vmul.f32 %v1491_v30, %v935_v21  ;;  %v800_v14 = vpop.xlane.xlu1 %799  ;;  %1494 = vrcp.f32 %v786_v35  ;;  %vm835_vm2 = vmor %vm833_vm0, %vm834_vm7  ;;  %v854_v43 = vand.u32 2147483648, %v786_v35 }
 0x332   :  { %v830_v16 = vsub.f32 1.0, %v829_v7  ;;  %1496 = vrcp.f32 %v800_v14  ;;  %v957_v22 = vand.u32 2147483647, %v800_v14  ;;  %v959_v45 = vand.u32 2147483648, %v800_v14 }
 0x333   :  { %1053 = vst [vmem:[#allocation10] sm:$0xff] %v827_v48  ;;  %v937_v40 = vadd.f32 %v1491_v30, %v936_v46  ;;  %vm953_vm12 = vweird.f32 %v800_v14  ;;  %vm848_vm8 = vweird.f32 %v786_v35 }
 0x334   :  { %v831_v32 = vmul.f32 %v1493_v31, %v830_v16  ;;  %vm958_vm9 = vcmp.eq.f32.partialorder %v957_v22, 8.507059e+37  ;;  %v960_v25 = vor.u32 1.1754944e-38, %v959_v45 }
 0x335   :  { %v941_v44 = vsel %vm940_vm3, %v1491_v30, %v937_v40 }
 0x336   :  { %v946_v61 = vsel %vm943_vm4, %v945_v17, %v941_v44  ;;  %v832_v19 = vadd.f32 %v1493_v31, %v831_v32 }
 0x337   :  { %v947_v53 = vmul.f32 %v946_v61, %v2219_v56  ;;  %v802_v36 = vpop.xlane.xlu2 %801  ;;  %v1495_v59 = vpop.eup %1494  ;;  %v852_v56 = vand.u32 2147483647, %v786_v35 }
 0x338   :  { %1498 = vrcp.f32 %v802_v36  ;;  %v1497_v12 = vpop.eup %1496  ;;  %v836_v11 = vsel %vm835_vm2, %v1493_v31, %v832_v19  ;;  %v844_v62 = vmul.f32 %v1495_v59, %v786_v35  ;;  %vm849_vm5 = vweird.f32 %v1495_v59 }
 0x339   :  { %1061 = vst [vmem:[#allocation10 + $0x40] sm:$0xff] %v947_v53  ;;  %v841_v41 = vsel %vm838_vm11, %v840_v33, %v836_v11  ;;  %v949_v50 = vmul.f32 %v1497_v12, %v800_v14  ;;  %vm954_vm14 = vweird.f32 %v1497_v12  ;;  %vm850_vm10 = vmor %vm848_vm8, %vm849_vm5  ;;  %vm853_vm1 = vcmp.eq.f32.partialorder %v852_v56, 8.507059e+37 }
 0x33a   :  { %v842_v63 = vmul.f32 %v841_v41, %v2234_v18  ;;  %v845_v10 = vsub.f32 1.0, %v844_v62  ;;  %v855_v18 = vor.u32 1.1754944e-38, %v854_v43  ;;  %vm955_vm15 = vmor %vm953_vm12, %vm954_vm14  ;;  %v972_v30 = vand.u32 2147483647, %v802_v36 }
 0x33b   :  { %v950_v60 = vsub.f32 1.0, %v949_v50  ;;  %v974_v37 = vand.u32 2147483648, %v802_v36  ;;  %vm968_vm13 = vweird.f32 %v802_v36 }
 0x33c   :  { %1054 = vst [vmem:[#allocation10 + $0x8] sm:$0xff] %v842_v63  ;;  %v846_v28 = vmul.f32 %v1495_v59, %v845_v10  ;;  %vm973_vm4 = vcmp.eq.f32.partialorder %v972_v30, 8.507059e+37 }
 0x33d   :  { %v804_v20 = vpop.xlane.xlu0 %803  ;;  %v951_v23 = vmul.f32 %v1497_v12, %v950_v60  ;;  %v975_v7 = vor.u32 1.1754944e-38, %v974_v37 }
 0x33e   :  { %v1499_v24 = vpop.eup %1498  ;;  %1500 = vrcp.f32 %v804_v20  ;;  %v847_v4 = vadd.f32 %v1495_v59, %v846_v28  ;;  %v987_v3 = vand.u32 2147483647, %v804_v20  ;;  %vm983_vm0 = vweird.f32 %v804_v20 }
 0x33f   :  { %v964_v6 = vmul.f32 %v1499_v24, %v802_v36  ;;  %v952_v15 = vadd.f32 %v1497_v12, %v951_v23  ;;  %vm969_vm6 = vweird.f32 %v1499_v24 }
 0x340   :  { %v851_v39 = vsel %vm850_vm10, %v1495_v59, %v847_v4  ;;  %v788_v55 = vpop.xlane.xlu1 %787  ;;  %vm970_vm3 = vmor %vm968_vm13, %vm969_vm6  ;;  %vm988_vm11 = vcmp.eq.f32.partialorder %v987_v3, 8.507059e+37 }
 0x341   :  { %v965_v9 = vsub.f32 1.0, %v964_v6  ;;  %v956_v51 = vsel %vm955_vm15, %v1497_v12, %v952_v15  ;;  %v856_v57 = vsel %vm853_vm1, %v855_v18, %v851_v39  ;;  %1502 = vrcp.f32 %v788_v55 }
 0x342   :  { %v961_v21 = vsel %vm958_vm9, %v960_v25, %v956_v51  ;;  %v857_v31 = vmul.f32 %v856_v57, %v2259_v54  ;;  %v989_v54 = vand.u32 2147483648, %v804_v20  ;;  %v869_v36 = vand.u32 2147483648, %v788_v55 }
 0x343   :  { %v966_v38 = vmul.f32 %v1499_v24, %v965_v9  ;;  %v962_v29 = vmul.f32 %v961_v21, %v2269_v58  ;;  %v867_v12 = vand.u32 2147483647, %v788_v55  ;;  %vm863_vm14 = vweird.f32 %v788_v55 }
 0x344   :  { %v1501_v34 = vpop.eup %1500  ;;  %1055 = vst [vmem:[#allocation10 + $0x10] sm:$0xff] %v857_v31  ;;  %v990_v19 = vor.u32 1.1754944e-38, %v989_v54  ;;  %v870_v10 = vor.u32 1.1754944e-38, %v869_v36 }
 0x345   :  { %v967_v48 = vadd.f32 %v1499_v24, %v966_v38  ;;  %v979_v46 = vmul.f32 %v1501_v34, %v804_v20  ;;  %1062 = vst [vmem:[#allocation10 + $0x48] sm:$0xff] %v962_v29  ;;  %vm984_vm7 = vweird.f32 %v1501_v34  ;;  %vm868_vm8 = vcmp.eq.f32.partialorder %v867_v12, 8.507059e+37 }
 0x346   :  { %v790_v40 = vpop.xlane.xlu2 %789  ;;  %vm985_vm2 = vmor %vm983_vm0, %vm984_vm7 }
 0x347   :  { %v971_v35 = vsel %vm970_vm3, %v1499_v24, %v967_v48  ;;  %v980_v14 = vsub.f32 1.0, %v979_v46  ;;  %v1503_v16 = vpop.eup %1502  ;;  %1504 = vrcp.f32 %v790_v40  ;;  %v882_v28 = vand.u32 2147483647, %v790_v40 }
 0x348   :  { %v976_v17 = vsel %vm973_vm4, %v975_v7, %v971_v35  ;;  %v859_v58 = vmul.f32 %v1503_v16, %v788_v55  ;;  %v806_v42 = vpop.xlane.xlu1 %805  ;;  %vm864_vm5 = vweird.f32 %v1503_v16  ;;  %v884_v20 = vand.u32 2147483648, %v790_v40 }
 0x349   :  { %v977_v44 = vmul.f32 %v976_v17, %v2290_v2  ;;  %v981_v32 = vmul.f32 %v1501_v34, %v980_v14  ;;  %1506 = vrcp.f32 %v806_v42  ;;  %vm865_vm12 = vmor %vm863_vm14, %vm864_vm5  ;;  %vm878_vm10 = vweird.f32 %v790_v40 }
 0x34a   :  { %v860_v53 = vsub.f32 1.0, %v859_v58  ;;  %v1004_v6 = vand.u32 2147483648, %v806_v42  ;;  %v1002_v25 = vand.u32 2147483647, %v806_v42  ;;  %v885_v39 = vor.u32 1.1754944e-38, %v884_v20 }
 0x34b   :  { %1063 = vst [vmem:[#allocation10 + $0x50] sm:$0xff] %v977_v44  ;;  %v982_v61 = vadd.f32 %v1501_v34, %v981_v32  ;;  %vm883_vm6 = vcmp.eq.f32.partialorder %v882_v28, 8.507059e+37  ;;  %vm998_vm13 = vweird.f32 %v806_v42 }
 0x34c   :  { %v861_v33 = vmul.f32 %v1503_v16, %v860_v53  ;;  %v1005_v51 = vor.u32 1.1754944e-38, %v1004_v6  ;;  %vm1003_vm4 = vcmp.eq.f32.partialorder %v1002_v25, 8.507059e+37 }
 0x34d   :  { %v986_v59 = vsel %vm985_vm2, %v1501_v34, %v982_v61  ;;  %v1505_v11 = vpop.eup %1504 }
 0x34e   :  { %v991_v62 = vsel %vm988_vm11, %v990_v19, %v986_v59  ;;  %v862_v41 = vadd.f32 %v1503_v16, %v861_v33  ;;  %v874_v50 = vmul.f32 %v1505_v11, %v790_v40  ;;  %vm879_vm9 = vweird.f32 %v1505_v11 }
 0x34f   :  { %v992_v2 = vmul.f32 %v991_v62, %v2313_v27  ;;  %v1507_v63 = vpop.eup %1506  ;;  %v2478_v60 = vpop.xlane.xlu0 %791  ;;  %vm880_vm15 = vmor %vm878_vm10, %vm879_vm9 }
 0x350   :  { %v866_v22 = vsel %vm865_vm12, %v1503_v16, %v862_v41  ;;  %v875_v56 = vsub.f32 1.0, %v874_v50  ;;  %v994_v43 = vmul.f32 %v1507_v63, %v806_v42  ;;  %1508 = vrcp.f32 %v2478_v60 }
 0x351   :  { %1064 = vst [vmem:[#allocation10 + $0x58] sm:$0xff] %v992_v2  ;;  %v871_v45 = vsel %vm868_vm8, %v870_v10, %v866_v22  ;;  %v2481_v24 = vpop.xlane.xlu1 %793  ;;  %vm999_vm1 = vweird.f32 %v1507_v63  ;;  %v897_v35 = vand.u32 2147483647, %v2478_v60  ;;  %vm893_vm0 = vweird.f32 %v2478_v60 }
 0x352   :  { %v872_v27 = vmul.f32 %v871_v45, %v2334_v0  ;;  %v876_v23 = vmul.f32 %v1505_v11, %v875_v56  ;;  %v995_v4 = vsub.f32 1.0, %v994_v43  ;;  %1510 = vrcp.f32 %v2481_v24  ;;  %vm1000_vm3 = vmor %vm998_vm13, %vm999_vm1 }
 0x353   :  { %v912_v16 = vand.u32 2147483647, %v2481_v24  ;;  %v914_v17 = vand.u32 2147483648, %v2481_v24  ;;  %vm898_vm5 = vcmp.eq.f32.partialorder %v897_v35, 8.507059e+37  ;;  %vm908_vm14 = vweird.f32 %v2481_v24 }
 0x354   :  { %1056 = vst [vmem:[#allocation10 + $0x18] sm:$0xff] %v872_v27  ;;  %v877_v15 = vadd.f32 %v1505_v11, %v876_v23  ;;  %v996_v18 = vmul.f32 %v1507_v63, %v995_v4 }
 0x355   :  { %vm913_vm12 = vcmp.eq.f32.partialorder %v912_v16, 8.507059e+37  ;;  %v915_v36 = vor.u32 1.1754944e-38, %v914_v17 }
 0x356   :  { %v881_v9 = vsel %vm880_vm15, %v1505_v11, %v877_v15  ;;  %v997_v30 = vadd.f32 %v1507_v63, %v996_v18  ;;  %v1509_v55 = vpop.eup %1508 }
 0x357   :  { %v886_v0 = vsel %vm883_vm6, %v885_v39, %v881_v9  ;;  %v2485_v57 = vpop.xlane.xlu0 %809  ;;  %v889_v31 = vmul.f32 %v1509_v55, %v2478_v60  ;;  %vm894_vm7 = vweird.f32 %v1509_v55 }
 0x358   :  { %v887_v37 = vmul.f32 %v886_v0, %v2355_v26  ;;  %v1001_v21 = vsel %vm1000_vm3, %v1507_v63, %v997_v30  ;;  %v1511_v38 = vpop.eup %1510  ;;  %1512 = vrcp.f32 %v2485_v57  ;;  %v2490_v29 = vpop.xlane.xlu2 %795  ;;  %v899_v26 = vand.u32 2147483648, %v2478_v60  ;;  %vm895_vm11 = vmor %vm893_vm0, %vm894_vm7 }
 0x359   :  { %v1006_v34 = vsel %vm1003_vm4, %v1005_v51, %v1001_v21  ;;  %v890_v46 = vsub.f32 1.0, %v889_v31  ;;  %v904_v7 = vmul.f32 %v1511_v38, %v2481_v24  ;;  %1514 = vrcp.f32 %v2490_v29 }
 0x35a   :  { %1057 = vst [vmem:[#allocation10 + $0x20] sm:$0xff] %v887_v37  ;;  %v1007_v48 = vmul.f32 %v1006_v34, %v2365_v1  ;;  %vm909_vm2 = vweird.f32 %v1511_v38  ;;  %v900_v32 = vor.u32 1.1754944e-38, %v899_v26  ;;  %v1032_v59 = vand.u32 2147483647, %v2485_v57 }
 0x35b   :  { %v891_v14 = vmul.f32 %v1509_v55, %v890_v46  ;;  %v905_v40 = vsub.f32 1.0, %v904_v7  ;;  %vm910_vm8 = vmor %vm908_vm14, %vm909_vm2  ;;  %v1034_v33 = vand.u32 2147483648, %v2485_v57  ;;  %v927_v63 = vand.u32 2147483647, %v2490_v29 }
 0x35c   :  { %1065 = vst [vmem:[#allocation10 + $0x60] sm:$0xff] %v1007_v48  ;;  %v929_v10 = vand.u32 2147483648, %v2490_v29  ;;  %vm1028_vm10 = vweird.f32 %v2485_v57  ;;  %vm1033_vm6 = vcmp.eq.f32.partialorder %v1032_v59, 8.507059e+37  ;;  %vm923_vm13 = vweird.f32 %v2490_v29 }
 0x35d   :  { %v892_v3 = vadd.f32 %v1509_v55, %v891_v14  ;;  %v906_v1 = vmul.f32 %v1511_v38, %v905_v40  ;;  %v1035_v20 = vor.u32 1.1754944e-38, %v1034_v33  ;;  %vm928_vm3 = vcmp.eq.f32.partialorder %v927_v63, 8.507059e+37 }
 0x35e   :  { %v2500_v54 = vpop.xlane.xlu1 %811  ;;  %v1513_v44 = vpop.eup %1512  ;;  %v930_v27 = vor.u32 1.1754944e-38, %v929_v10 }
 0x35f   :  { %1516 = vrcp.f32 %v2500_v54  ;;  %v896_v58 = vsel %vm895_vm11, %v1509_v55, %v892_v3  ;;  %v907_v42 = vadd.f32 %v1511_v38, %v906_v1  ;;  %v1024_v61 = vmul.f32 %v1513_v44, %v2485_v57  ;;  %v1515_v53 = vpop.eup %1514 }
 0x360   :  { %v901_v19 = vsel %vm898_vm5, %v900_v32, %v896_v58  ;;  %v2507_v12 = vpop.xlane.xlu2 %807  ;;  %v919_v41 = vmul.f32 %v1515_v53, %v2490_v29  ;;  %vm1029_vm9 = vweird.f32 %v1513_v44  ;;  %vm924_vm1 = vweird.f32 %v1515_v53 }
 0x361   :  { %v902_v11 = vmul.f32 %v901_v19, %v2392_v8  ;;  %v911_v62 = vsel %vm910_vm8, %v1511_v38, %v907_v42  ;;  %v1025_v2 = vsub.f32 1.0, %v1024_v61  ;;  %1518 = vrcp.f32 %v2507_v12  ;;  %vm1030_vm15 = vmor %vm1028_vm10, %vm1029_vm9 }
 0x362   :  { %v916_v50 = vsel %vm913_vm12, %v915_v36, %v911_v62  ;;  %v920_v56 = vsub.f32 1.0, %v919_v41  ;;  %vm925_vm4 = vmor %vm923_vm13, %vm924_vm1  ;;  %v1047_v15 = vand.u32 2147483647, %v2500_v54  ;;  %v1049_v18 = vand.u32 2147483648, %v2500_v54 }
 0x363   :  { %1058 = vst [vmem:[#allocation10 + $0x28] sm:$0xff] %v902_v11  ;;  %v917_v60 = vmul.f32 %v916_v50, %v2407_v13  ;;  %v1026_v22 = vmul.f32 %v1513_v44, %v1025_v2  ;;  %vm1043_vm0 = vweird.f32 %v2500_v54  ;;  %v1019_v21 = vand.u32 2147483648, %v2507_v12 }
 0x364   :  { %v921_v45 = vmul.f32 %v1515_v53, %v920_v56  ;;  %vm1048_vm11 = vcmp.eq.f32.partialorder %v1047_v15, 8.507059e+37  ;;  %v1050_v37 = vor.u32 1.1754944e-38, %v1049_v18  ;;  %v1017_v38 = vand.u32 2147483647, %v2507_v12 }
 0x365   :  { %v1517_v43 = vpop.eup %1516  ;;  %1059 = vst [vmem:[#allocation10 + $0x30] sm:$0xff] %v917_v60  ;;  %v1027_v8 = vadd.f32 %v1513_v44, %v1026_v22  ;;  %vm1013_vm14 = vweird.f32 %v2507_v12 }
 0x366   :  { %v1039_v28 = vmul.f32 %v1517_v43, %v2500_v54  ;;  %v922_v13 = vadd.f32 %v1515_v53, %v921_v45  ;;  %vm1044_vm7 = vweird.f32 %v1517_v43  ;;  %vm1018_vm8 = vcmp.eq.f32.partialorder %v1017_v38, 8.507059e+37 }
 0x367   :  { %v1031_v24 = vsel %vm1030_vm15, %v1513_v44, %v1027_v8  ;;  %v1519_v4 = vpop.eup %1518  ;;  %vm1045_vm2 = vmor %vm1043_vm0, %vm1044_vm7 }
 0x368   :  { %v1040_v23 = vsub.f32 1.0, %v1039_v28  ;;  %v1036_v6 = vsel %vm1033_vm6, %v1035_v20, %v1031_v24  ;;  %v926_v39 = vsel %vm925_vm4, %v1515_v53, %v922_v13  ;;  %v1009_v30 = vmul.f32 %v1519_v4, %v2507_v12 }
 0x369   :  { %v1037_v25 = vmul.f32 %v1036_v6, %v2428_v52  ;;  %v931_v55 = vsel %vm928_vm3, %v930_v27, %v926_v39  ;;  %vm1014_vm5 = vweird.f32 %v1519_v4 }
 0x36a   :  { %v1041_v9 = vmul.f32 %v1517_v43, %v1040_v23  ;;  %v932_v0 = vmul.f32 %v931_v55, %v2439_v47  ;;  %v1010_v57 = vsub.f32 1.0, %v1009_v30  ;;  %vm1015_vm12 = vmor %vm1013_vm14, %vm1014_vm5  ;;  %v1020_v47 = vor.u32 1.1754944e-38, %v1019_v21 }
 0x36b   :  { %1067 = vst [vmem:[#allocation10 + $0x70] sm:$0xff] %v1037_v25 }
 0x36c   :  { %v1042_v51 = vadd.f32 %v1517_v43, %v1041_v9  ;;  %1060 = vst [vmem:[#allocation10 + $0x38] sm:$0xff] %v932_v0  ;;  %v1011_v52 = vmul.f32 %v1519_v4, %v1010_v57 }
 0x36e   :  { %v1046_v31 = vsel %vm1045_vm2, %v1517_v43, %v1042_v51  ;;  %v1012_v48 = vadd.f32 %v1519_v4, %v1011_v52 }
 0x36f   :  { %v1051_v34 = vsel %vm1048_vm11, %v1050_v37, %v1046_v31 }
 0x370   :  { %v1052_v29 = vmul.f32 %v1051_v34, %v2452_v49  ;;  %v1016_v46 = vsel %vm1015_vm12, %v1519_v4, %v1012_v48 }
 0x371   :  { %v1021_v7 = vsel %vm1018_vm8, %v1020_v47, %v1016_v46 }
 0x372   :  { %1068 = vst [vmem:[#allocation10 + $0x78] sm:$0xff] %v1052_v29  ;;  %v1022_v35 = vmul.f32 %v1021_v7, %v2462_v5 }
 0x374   :  { %1066 = vst [vmem:[#allocation10 + $0x68] sm:$0xff] %v1022_v35 }
 0x375   :  { %1163 = dma.vmem_to_hbm [thread:$0]  %s1156_s18, 2048, %s1158_s21, [#allocation4], %s1678_s30, %s1678_s30, %s1679_s6  }
 0x376   :  { %1670 = dma.done.wait [#allocation4], 2048  }
 0x377   :  { %1671 = vsyncadd [#allocation4], 4294965248 }
 0x378   :  { %1672 = dma.done.wait [#allocation12], 2048  }
 0x379   :  { %1673 = vsyncadd [#allocation12], 4294965248 }
 0x37a   :  { %1185 = vsyncpa [#allocation3], 1 }
 0x37b   :  { %1186 = vsyncpa [#allocation6], 1 }
 0x37c   :  { %1187 = vsyncpa [#allocation9], 1 }
 0x37d   :  { %1188 = vsyncpa [#allocation4], 1 }
 0x37e   :  { %1189 = vsyncpa [#allocation12], 1 }

</bundles_post_ra>
